<compile_context>
chip_gen: v7x
topology: tpu7x:2x2x1
jax: 0.10.0
libtpu: 0.0.40
codegen_flags: <defaults>
</compile_context>

<pallas_src>
import jax
import jax.numpy as jnp
from jax.experimental import pallas as pl
from jax.experimental.pallas import tpu as pltpu


_VMEM = pl.BlockSpec(memory_space=pltpu.MemorySpace.VMEM)


def _make_fused_encoder_kernel(num_layers, batch, seq_len, hidden):
    """Builds the single fused kernel: embedding lookup + stacked LSTM.

    Ref order (all VMEM):
      ids_ref   : (T*B, 1) int32, time-major flattened token ids
      table_ref : (V, E)   embedding table
      per layer l: wih_t (Din_l, 4H), whh_t (H, 4H), bias (1, 4H) = b_ih + b_hh
      out_ref   : (T*B, H) last layer's per-step hidden states (time-major)
      hn_ref    : (L, B, H) final hidden state per layer
      cn_ref    : (L, B, H) final cell state per layer
    """

    def sigmoid(x):
        return 1.0 / (1.0 + jnp.exp(-x))

    def kernel(*refs):
        ids_ref, table_ref = refs[0], refs[1]
        w_refs = refs[2:2 + 3 * num_layers]
        out_ref, hn_ref, cn_ref = refs[2 + 3 * num_layers:]

        n = seq_len * batch
        vocab = table_ref.shape[0]

        # ---- embedding lookup: lane-dense one-hot MXU matmul ----
        ids = ids_ref[...]                                              # (N, 1)
        vocab_iota = jax.lax.broadcasted_iota(jnp.int32, (n, vocab), 1)
        onehot = (vocab_iota == ids).astype(jnp.float32)                # (N, V)
        x = jnp.dot(onehot, table_ref[...],
                    preferred_element_type=jnp.float32)                 # (N, E)

        # ---- stacked LSTM layers, fully VMEM-resident ----
        for l in range(num_layers):
            wih_t = w_refs[3 * l][...]                                  # (Din, 4H)
            whh_t = w_refs[3 * l + 1][...]                              # (H, 4H)
            bias = w_refs[3 * l + 2][...]                               # (1, 4H)

            # All timesteps' input projections in one MXU matmul, biases folded.
            xproj = jnp.dot(x, wih_t,
                            preferred_element_type=jnp.float32) + bias  # (N, 4H)

            h = jnp.zeros((batch, hidden), jnp.float32)
            c = jnp.zeros((batch, hidden), jnp.float32)
            for t in range(seq_len):                                    # unrolled recurrence
                gates = xproj[t * batch:(t + 1) * batch, :] + jnp.dot(
                    h, whh_t, preferred_element_type=jnp.float32)       # (B, 4H)
                i_g = sigmoid(gates[:, 0 * hidden:1 * hidden])
                f_g = sigmoid(gates[:, 1 * hidden:2 * hidden])
                g_g = jnp.tanh(gates[:, 2 * hidden:3 * hidden])
                o_g = sigmoid(gates[:, 3 * hidden:4 * hidden])
                c = f_g * c + i_g * g_g
                h = o_g * jnp.tanh(c)
                # out_ref doubles as the inter-layer activation buffer.
                out_ref[t * batch:(t + 1) * batch, :] = h

            hn_ref[l] = h
            cn_ref[l] = c
            if l + 1 < num_layers:
                # Next layer consumes this layer's per-step hidden states.
                x = out_ref[...]                                        # (N, H)

        # TODO(synk): nn.LSTM inter-layer dropout (training-only) intentionally omitted.

    return kernel


def input_encoder_forward(x_ids, emb_table, lstm_params):
    """x_ids: (B, T) int32.  emb_table: (V, E).
    lstm_params: per-layer (w_ih (4H, Din), w_hh (4H, H), b_ih (4H,), b_hh (4H,)).
    Returns (output (B, T, H), (h_n (L, B, H), c_n (L, B, H)))."""
    B, T = x_ids.shape
    L = len(lstm_params)
    H = lstm_params[0][1].shape[1]                                      # w_hh: (4H, H)

    # Time-major flatten of the token ids (row n = t*B + b).
    ids_tm = jnp.transpose(x_ids.astype(jnp.int32)).reshape(T * B, 1)

    weight_args = []
    for (w_ih, w_hh, b_ih, b_hh) in lstm_params:
        weight_args.append(jnp.asarray(w_ih, jnp.float32).T)            # (Din, 4H)
        weight_args.append(jnp.asarray(w_hh, jnp.float32).T)            # (H, 4H)
        weight_args.append(
            (jnp.asarray(b_ih, jnp.float32)
             + jnp.asarray(b_hh, jnp.float32)).reshape(1, 4 * H))       # (1, 4H)

    kernel = _make_fused_encoder_kernel(L, B, T, H)
    n_in = 2 + 3 * L

    y_tm, h_n, c_n = pl.pallas_call(
        kernel,
        out_shape=(
            jax.ShapeDtypeStruct((T * B, H), jnp.float32),
            jax.ShapeDtypeStruct((L, B, H), jnp.float32),
            jax.ShapeDtypeStruct((L, B, H), jnp.float32),
        ),
        in_specs=[_VMEM] * n_in,
        out_specs=(_VMEM, _VMEM, _VMEM),
    )(ids_tm, jnp.asarray(emb_table, jnp.float32), *weight_args)

    # (T*B, H) time-major -> (B, T, H) batch_first.
    output = y_tm.reshape(T, B, H).transpose(1, 0, 2)
    return output, (h_n, c_n)


def _reference_forward(x_ids, emb_table, lstm_params):
    """Pure-JAX reference matching PyTorch Embedding + multi-layer LSTM."""
    B = x_ids.shape[0]
    layer_in = jnp.take(emb_table, x_ids, axis=0)                       # (B, T, E)
    hs, cs = [], []
    for (w_ih, w_hh, b_ih, b_hh) in lstm_params:
        H = w_hh.shape[1]

        def step(carry, x_t, w_ih=w_ih, w_hh=w_hh, b_ih=b_ih, b_hh=b_hh, H=H):
            h, c = carry
            gates = x_t @ w_ih.T + h @ w_hh.T + b_ih + b_hh
            i = jax.nn.sigmoid(gates[:, 0:H])
            f = jax.nn.sigmoid(gates[:, H:2 * H])
            g = jnp.tanh(gates[:, 2 * H:3 * H])
            o = jax.nn.sigmoid(gates[:, 3 * H:4 * H])
            c = f * c + i * g
            h = o * jnp.tanh(c)
            return (h, c), h

        init = (jnp.zeros((B, H), jnp.float32), jnp.zeros((B, H), jnp.float32))
        (hT, cT), ys = jax.lax.scan(step, init, jnp.transpose(layer_in, (1, 0, 2)))
        layer_in = jnp.transpose(ys, (1, 0, 2))
        hs.append(hT)
        cs.append(cT)
    return layer_in, (jnp.stack(hs, 0), jnp.stack(cs, 0))


if __name__ == "__main__":
    VOCAB, EMB, HID, LAYERS = 64, 32, 32, 2
    B, T = 2, 8

    key = jax.random.PRNGKey(0)
    keys = jax.random.split(key, 2 + 4 * LAYERS)
    k_ids, k_emb = keys[0], keys[1]
    k_layers = keys[2:]

    # Token ids (include padding_idx=0 tokens).
    x_ids = jax.random.randint(k_ids, (B, T), 0, VOCAB, dtype=jnp.int32)
    x_ids = x_ids.at[:, -1].set(0)

    # Embedding table; padding_idx=0 row is zero as in nn.Embedding(padding_idx=0).
    emb_table = jax.random.normal(k_emb, (VOCAB, EMB), dtype=jnp.float32)
    emb_table = emb_table.at[0].set(0.0)

    # LSTM weights with PyTorch-style uniform(-1/sqrt(H), 1/sqrt(H)) init,
    # gate order (i, f, g, o) along the 4H axis.
    bound = 1.0 / float(jnp.sqrt(jnp.float32(HID)))
    lstm_params = []
    for l in range(LAYERS):
        d_in = EMB if l == 0 else HID
        ks = k_layers[4 * l:4 * l + 4]
        w_ih = jax.random.uniform(ks[0], (4 * HID, d_in), minval=-bound, maxval=bound,
                                  dtype=jnp.float32)
        w_hh = jax.random.uniform(ks[1], (4 * HID, HID), minval=-bound, maxval=bound,
                                  dtype=jnp.float32)
        b_ih = jax.random.uniform(ks[2], (4 * HID,), minval=-bound, maxval=bound,
                                  dtype=jnp.float32)
        b_hh = jax.random.uniform(ks[3], (4 * HID,), minval=-bound, maxval=bound,
                                  dtype=jnp.float32)
        lstm_params.append((w_ih, w_hh, b_ih, b_hh))

    out, (h_n, c_n) = input_encoder_forward(x_ids, emb_table, lstm_params)
    out = jax.block_until_ready(out)

    ref_out, (ref_h, ref_c) = _reference_forward(x_ids, emb_table, lstm_params)

    assert out.shape == (B, T, HID)
    assert h_n.shape == (LAYERS, B, HID) and c_n.shape == (LAYERS, B, HID)
    assert jnp.allclose(out, ref_out, atol=2e-4, rtol=2e-4)
    assert jnp.allclose(h_n, ref_h, atol=2e-4, rtol=2e-4)
    assert jnp.allclose(c_n, ref_c, atol=2e-4, rtol=2e-4)

    print("KERNEL_OK")
</pallas_src>

<mosaic_0001>
module attributes {stable_mosaic.version = 11 : i64} {
  func.func @kernel(%arg0: memref<16x1xi32, #tpu.memory_space<vmem>>, %arg1: memref<64x32xf32, #tpu.memory_space<vmem>>, %arg2: memref<32x128xf32, #tpu.memory_space<vmem>>, %arg3: memref<32x128xf32, #tpu.memory_space<vmem>>, %arg4: memref<1x128xf32, #tpu.memory_space<vmem>>, %arg5: memref<32x128xf32, #tpu.memory_space<vmem>>, %arg6: memref<32x128xf32, #tpu.memory_space<vmem>>, %arg7: memref<1x128xf32, #tpu.memory_space<vmem>>, %arg8: memref<16x32xf32, #tpu.memory_space<vmem>>, %arg9: memref<2x2x32xf32, #tpu.memory_space<vmem>>, %arg10: memref<2x2x32xf32, #tpu.memory_space<vmem>>) attributes {dimension_semantics = [], scalar_prefetch = 0 : i64, scratch_operands = 0 : i64, tpu.core_type = #tpu.core_type<tc>} {
    %c0 = arith.constant 0 : index
    %c0_0 = arith.constant 0 : index
    %0 = vector.load %arg0[%c0, %c0_0] : memref<16x1xi32, #tpu.memory_space<vmem>>, vector<16x1xi32>
    %1 = tpu.iota {dimensions = array<i32: 1>} : vector<16x64xi32>
    %2 = vector.broadcast %0 : vector<16x1xi32> to vector<16x64xi32>
    %3 = arith.cmpi eq, %1, %2 : vector<16x64xi32>
    %4 = arith.extui %3 : vector<16x64xi1> to vector<16x64xi32>
    %5 = arith.sitofp %4 : vector<16x64xi32> to vector<16x64xf32>
    %c0_1 = arith.constant 0 : index
    %c0_2 = arith.constant 0 : index
    %6 = vector.load %arg1[%c0_1, %c0_2] : memref<64x32xf32, #tpu.memory_space<vmem>>, vector<64x32xf32>
    %cst = arith.constant dense<0.000000e+00> : vector<16x32xf32>
    %7 = tpu.matmul %5, %6, %cst {dimension_numbers = #tpu.dot_dimension_numbers<[1], [0], [0], [1], [0, 0, 1, 1], [], []>} : vector<16x64xf32>, vector<64x32xf32>, vector<16x32xf32> -> vector<16x32xf32>
    %c0_3 = arith.constant 0 : index
    %c0_4 = arith.constant 0 : index
    %8 = vector.load %arg2[%c0_3, %c0_4] : memref<32x128xf32, #tpu.memory_space<vmem>>, vector<32x128xf32>
    %c0_5 = arith.constant 0 : index
    %c0_6 = arith.constant 0 : index
    %9 = vector.load %arg3[%c0_5, %c0_6] : memref<32x128xf32, #tpu.memory_space<vmem>>, vector<32x128xf32>
    %c0_7 = arith.constant 0 : index
    %c0_8 = arith.constant 0 : index
    %10 = vector.load %arg4[%c0_7, %c0_8] : memref<1x128xf32, #tpu.memory_space<vmem>>, vector<1x128xf32>
    %cst_9 = arith.constant dense<0.000000e+00> : vector<16x128xf32>
    %11 = tpu.matmul %7, %8, %cst_9 {dimension_numbers = #tpu.dot_dimension_numbers<[1], [0], [0], [1], [0, 0, 1, 1], [], []>} : vector<16x32xf32>, vector<32x128xf32>, vector<16x128xf32> -> vector<16x128xf32>
    %12 = vector.broadcast %10 : vector<1x128xf32> to vector<16x128xf32>
    %13 = arith.addf %11, %12 : vector<16x128xf32>
    %cst_10 = arith.constant 0.000000e+00 : f32
    %14 = vector.broadcast %cst_10 : f32 to vector<2x32xf32>
    %cst_11 = arith.constant 0.000000e+00 : f32
    %15 = vector.broadcast %cst_11 : f32 to vector<2x32xf32>
    %16 = vector.extract_strided_slice %13 {offsets = [0, 0], sizes = [2, 128], strides = [1, 1]} : vector<16x128xf32> to vector<2x128xf32>
    %cst_12 = arith.constant dense<0.000000e+00> : vector<2x128xf32>
    %17 = tpu.matmul %14, %9, %cst_12 {dimension_numbers = #tpu.dot_dimension_numbers<[1], [0], [0], [1], [0, 0, 1, 1], [], []>} : vector<2x32xf32>, vector<32x128xf32>, vector<2x128xf32> -> vector<2x128xf32>
    %18 = arith.addf %16, %17 : vector<2x128xf32>
    %19 = vector.extract_strided_slice %18 {offsets = [0, 0], sizes = [2, 32], strides = [1, 1]} : vector<2x128xf32> to vector<2x32xf32>
    %cst_13 = arith.constant 0.000000e+00 : f32
    %20 = vector.broadcast %cst_13 : f32 to vector<2x32xf32>
    %21 = arith.subf %20, %19 : vector<2x32xf32>
    %22 = math.exp %21 : vector<2x32xf32>
    %cst_14 = arith.constant 1.000000e+00 : f32
    %23 = vector.broadcast %cst_14 : f32 to vector<2x32xf32>
    %24 = arith.addf %23, %22 : vector<2x32xf32>
    %cst_15 = arith.constant 1.000000e+00 : f32
    %25 = vector.broadcast %cst_15 : f32 to vector<2x32xf32>
    %26 = arith.divf %25, %24 : vector<2x32xf32>
    %27 = vector.extract_strided_slice %18 {offsets = [0, 32], sizes = [2, 32], strides = [1, 1]} : vector<2x128xf32> to vector<2x32xf32>
    %cst_16 = arith.constant 0.000000e+00 : f32
    %28 = vector.broadcast %cst_16 : f32 to vector<2x32xf32>
    %29 = arith.subf %28, %27 : vector<2x32xf32>
    %30 = math.exp %29 : vector<2x32xf32>
    %cst_17 = arith.constant 1.000000e+00 : f32
    %31 = vector.broadcast %cst_17 : f32 to vector<2x32xf32>
    %32 = arith.addf %31, %30 : vector<2x32xf32>
    %cst_18 = arith.constant 1.000000e+00 : f32
    %33 = vector.broadcast %cst_18 : f32 to vector<2x32xf32>
    %34 = arith.divf %33, %32 : vector<2x32xf32>
    %35 = vector.extract_strided_slice %18 {offsets = [0, 64], sizes = [2, 32], strides = [1, 1]} : vector<2x128xf32> to vector<2x32xf32>
    %36 = math.tanh %35 : vector<2x32xf32>
    %37 = vector.extract_strided_slice %18 {offsets = [0, 96], sizes = [2, 32], strides = [1, 1]} : vector<2x128xf32> to vector<2x32xf32>
    %cst_19 = arith.constant 0.000000e+00 : f32
    %38 = vector.broadcast %cst_19 : f32 to vector<2x32xf32>
    %39 = arith.subf %38, %37 : vector<2x32xf32>
    %40 = math.exp %39 : vector<2x32xf32>
    %cst_20 = arith.constant 1.000000e+00 : f32
    %41 = vector.broadcast %cst_20 : f32 to vector<2x32xf32>
    %42 = arith.addf %41, %40 : vector<2x32xf32>
    %cst_21 = arith.constant 1.000000e+00 : f32
    %43 = vector.broadcast %cst_21 : f32 to vector<2x32xf32>
    %44 = arith.divf %43, %42 : vector<2x32xf32>
    %45 = arith.mulf %34, %15 : vector<2x32xf32>
    %46 = arith.mulf %26, %36 : vector<2x32xf32>
    %47 = arith.addf %45, %46 : vector<2x32xf32>
    %48 = math.tanh %47 : vector<2x32xf32>
    %49 = arith.mulf %44, %48 : vector<2x32xf32>
    %c0_22 = arith.constant 0 : index
    %c0_23 = arith.constant 0 : index
    %50 = vector.load %arg8[%c0_22, %c0_23] : memref<16x32xf32, #tpu.memory_space<vmem>>, vector<2x32xf32>
    tpu.vector_store %arg8[%c0_22, %c0_23], %49 {strides = array<i32>} : memref<16x32xf32, #tpu.memory_space<vmem>>, vector<2x32xf32>,
    %51 = vector.extract_strided_slice %13 {offsets = [2, 0], sizes = [2, 128], strides = [1, 1]} : vector<16x128xf32> to vector<2x128xf32>
    %cst_24 = arith.constant dense<0.000000e+00> : vector<2x128xf32>
    %52 = tpu.matmul %49, %9, %cst_24 {dimension_numbers = #tpu.dot_dimension_numbers<[1], [0], [0], [1], [0, 0, 1, 1], [], []>} : vector<2x32xf32>, vector<32x128xf32>, vector<2x128xf32> -> vector<2x128xf32>
    %53 = arith.addf %51, %52 : vector<2x128xf32>
    %54 = vector.extract_strided_slice %53 {offsets = [0, 0], sizes = [2, 32], strides = [1, 1]} : vector<2x128xf32> to vector<2x32xf32>
    %cst_25 = arith.constant 0.000000e+00 : f32
    %55 = vector.broadcast %cst_25 : f32 to vector<2x32xf32>
    %56 = arith.subf %55, %54 : vector<2x32xf32>
    %57 = math.exp %56 : vector<2x32xf32>
    %cst_26 = arith.constant 1.000000e+00 : f32
    %58 = vector.broadcast %cst_26 : f32 to vector<2x32xf32>
    %59 = arith.addf %58, %57 : vector<2x32xf32>
    %cst_27 = arith.constant 1.000000e+00 : f32
    %60 = vector.broadcast %cst_27 : f32 to vector<2x32xf32>
    %61 = arith.divf %60, %59 : vector<2x32xf32>
    %62 = vector.extract_strided_slice %53 {offsets = [0, 32], sizes = [2, 32], strides = [1, 1]} : vector<2x128xf32> to vector<2x32xf32>
    %cst_28 = arith.constant 0.000000e+00 : f32
    %63 = vector.broadcast %cst_28 : f32 to vector<2x32xf32>
    %64 = arith.subf %63, %62 : vector<2x32xf32>
    %65 = math.exp %64 : vector<2x32xf32>
    %cst_29 = arith.constant 1.000000e+00 : f32
    %66 = vector.broadcast %cst_29 : f32 to vector<2x32xf32>
    %67 = arith.addf %66, %65 : vector<2x32xf32>
    %cst_30 = arith.constant 1.000000e+00 : f32
    %68 = vector.broadcast %cst_30 : f32 to vector<2x32xf32>
    %69 = arith.divf %68, %67 : vector<2x32xf32>
    %70 = vector.extract_strided_slice %53 {offsets = [0, 64], sizes = [2, 32], strides = [1, 1]} : vector<2x128xf32> to vector<2x32xf32>
    %71 = math.tanh %70 : vector<2x32xf32>
    %72 = vector.extract_strided_slice %53 {offsets = [0, 96], sizes = [2, 32], strides = [1, 1]} : vector<2x128xf32> to vector<2x32xf32>
    %cst_31 = arith.constant 0.000000e+00 : f32
    %73 = vector.broadcast %cst_31 : f32 to vector<2x32xf32>
    %74 = arith.subf %73, %72 : vector<2x32xf32>
    %75 = math.exp %74 : vector<2x32xf32>
    %cst_32 = arith.constant 1.000000e+00 : f32
    %76 = vector.broadcast %cst_32 : f32 to vector<2x32xf32>
    %77 = arith.addf %76, %75 : vector<2x32xf32>
    %cst_33 = arith.constant 1.000000e+00 : f32
    %78 = vector.broadcast %cst_33 : f32 to vector<2x32xf32>
    %79 = arith.divf %78, %77 : vector<2x32xf32>
    %80 = arith.mulf %69, %47 : vector<2x32xf32>
    %81 = arith.mulf %61, %71 : vector<2x32xf32>
    %82 = arith.addf %80, %81 : vector<2x32xf32>
    %83 = math.tanh %82 : vector<2x32xf32>
    %84 = arith.mulf %79, %83 : vector<2x32xf32>
    %c2 = arith.constant 2 : index
    %c0_34 = arith.constant 0 : index
    %85 = vector.load %arg8[%c2, %c0_34] : memref<16x32xf32, #tpu.memory_space<vmem>>, vector<2x32xf32>
    tpu.vector_store %arg8[%c2, %c0_34], %84 {strides = array<i32>} : memref<16x32xf32, #tpu.memory_space<vmem>>, vector<2x32xf32>,
    %86 = vector.extract_strided_slice %13 {offsets = [4, 0], sizes = [2, 128], strides = [1, 1]} : vector<16x128xf32> to vector<2x128xf32>
    %cst_35 = arith.constant dense<0.000000e+00> : vector<2x128xf32>
    %87 = tpu.matmul %84, %9, %cst_35 {dimension_numbers = #tpu.dot_dimension_numbers<[1], [0], [0], [1], [0, 0, 1, 1], [], []>} : vector<2x32xf32>, vector<32x128xf32>, vector<2x128xf32> -> vector<2x128xf32>
    %88 = arith.addf %86, %87 : vector<2x128xf32>
    %89 = vector.extract_strided_slice %88 {offsets = [0, 0], sizes = [2, 32], strides = [1, 1]} : vector<2x128xf32> to vector<2x32xf32>
    %cst_36 = arith.constant 0.000000e+00 : f32
    %90 = vector.broadcast %cst_36 : f32 to vector<2x32xf32>
    %91 = arith.subf %90, %89 : vector<2x32xf32>
    %92 = math.exp %91 : vector<2x32xf32>
    %cst_37 = arith.constant 1.000000e+00 : f32
    %93 = vector.broadcast %cst_37 : f32 to vector<2x32xf32>
    %94 = arith.addf %93, %92 : vector<2x32xf32>
    %cst_38 = arith.constant 1.000000e+00 : f32
    %95 = vector.broadcast %cst_38 : f32 to vector<2x32xf32>
    %96 = arith.divf %95, %94 : vector<2x32xf32>
    %97 = vector.extract_strided_slice %88 {offsets = [0, 32], sizes = [2, 32], strides = [1, 1]} : vector<2x128xf32> to vector<2x32xf32>
    %cst_39 = arith.constant 0.000000e+00 : f32
    %98 = vector.broadcast %cst_39 : f32 to vector<2x32xf32>
    %99 = arith.subf %98, %97 : vector<2x32xf32>
    %100 = math.exp %99 : vector<2x32xf32>
    %cst_40 = arith.constant 1.000000e+00 : f32
    %101 = vector.broadcast %cst_40 : f32 to vector<2x32xf32>
    %102 = arith.addf %101, %100 : vector<2x32xf32>
    %cst_41 = arith.constant 1.000000e+00 : f32
    %103 = vector.broadcast %cst_41 : f32 to vector<2x32xf32>
    %104 = arith.divf %103, %102 : vector<2x32xf32>
    %105 = vector.extract_strided_slice %88 {offsets = [0, 64], sizes = [2, 32], strides = [1, 1]} : vector<2x128xf32> to vector<2x32xf32>
    %106 = math.tanh %105 : vector<2x32xf32>
    %107 = vector.extract_strided_slice %88 {offsets = [0, 96], sizes = [2, 32], strides = [1, 1]} : vector<2x128xf32> to vector<2x32xf32>
    %cst_42 = arith.constant 0.000000e+00 : f32
    %108 = vector.broadcast %cst_42 : f32 to vector<2x32xf32>
    %109 = arith.subf %108, %107 : vector<2x32xf32>
    %110 = math.exp %109 : vector<2x32xf32>
    %cst_43 = arith.constant 1.000000e+00 : f32
    %111 = vector.broadcast %cst_43 : f32 to vector<2x32xf32>
    %112 = arith.addf %111, %110 : vector<2x32xf32>
    %cst_44 = arith.constant 1.000000e+00 : f32
    %113 = vector.broadcast %cst_44 : f32 to vector<2x32xf32>
    %114 = arith.divf %113, %112 : vector<2x32xf32>
    %115 = arith.mulf %104, %82 : vector<2x32xf32>
    %116 = arith.mulf %96, %106 : vector<2x32xf32>
    %117 = arith.addf %115, %116 : vector<2x32xf32>
    %118 = math.tanh %117 : vector<2x32xf32>
    %119 = arith.mulf %114, %118 : vector<2x32xf32>
    %c4 = arith.constant 4 : index
    %c0_45 = arith.constant 0 : index
    %120 = vector.load %arg8[%c4, %c0_45] : memref<16x32xf32, #tpu.memory_space<vmem>>, vector<2x32xf32>
    tpu.vector_store %arg8[%c4, %c0_45], %119 {strides = array<i32>} : memref<16x32xf32, #tpu.memory_space<vmem>>, vector<2x32xf32>,
    %121 = vector.extract_strided_slice %13 {offsets = [6, 0], sizes = [2, 128], strides = [1, 1]} : vector<16x128xf32> to vector<2x128xf32>
    %cst_46 = arith.constant dense<0.000000e+00> : vector<2x128xf32>
    %122 = tpu.matmul %119, %9, %cst_46 {dimension_numbers = #tpu.dot_dimension_numbers<[1], [0], [0], [1], [0, 0, 1, 1], [], []>} : vector<2x32xf32>, vector<32x128xf32>, vector<2x128xf32> -> vector<2x128xf32>
    %123 = arith.addf %121, %122 : vector<2x128xf32>
    %124 = vector.extract_strided_slice %123 {offsets = [0, 0], sizes = [2, 32], strides = [1, 1]} : vector<2x128xf32> to vector<2x32xf32>
    %cst_47 = arith.constant 0.000000e+00 : f32
    %125 = vector.broadcast %cst_47 : f32 to vector<2x32xf32>
    %126 = arith.subf %125, %124 : vector<2x32xf32>
    %127 = math.exp %126 : vector<2x32xf32>
    %cst_48 = arith.constant 1.000000e+00 : f32
    %128 = vector.broadcast %cst_48 : f32 to vector<2x32xf32>
    %129 = arith.addf %128, %127 : vector<2x32xf32>
    %cst_49 = arith.constant 1.000000e+00 : f32
    %130 = vector.broadcast %cst_49 : f32 to vector<2x32xf32>
    %131 = arith.divf %130, %129 : vector<2x32xf32>
    %132 = vector.extract_strided_slice %123 {offsets = [0, 32], sizes = [2, 32], strides = [1, 1]} : vector<2x128xf32> to vector<2x32xf32>
    %cst_50 = arith.constant 0.000000e+00 : f32
    %133 = vector.broadcast %cst_50 : f32 to vector<2x32xf32>
    %134 = arith.subf %133, %132 : vector<2x32xf32>
    %135 = math.exp %134 : vector<2x32xf32>
    %cst_51 = arith.constant 1.000000e+00 : f32
    %136 = vector.broadcast %cst_51 : f32 to vector<2x32xf32>
    %137 = arith.addf %136, %135 : vector<2x32xf32>
    %cst_52 = arith.constant 1.000000e+00 : f32
    %138 = vector.broadcast %cst_52 : f32 to vector<2x32xf32>
    %139 = arith.divf %138, %137 : vector<2x32xf32>
    %140 = vector.extract_strided_slice %123 {offsets = [0, 64], sizes = [2, 32], strides = [1, 1]} : vector<2x128xf32> to vector<2x32xf32>
    %141 = math.tanh %140 : vector<2x32xf32>
    %142 = vector.extract_strided_slice %123 {offsets = [0, 96], sizes = [2, 32], strides = [1, 1]} : vector<2x128xf32> to vector<2x32xf32>
    %cst_53 = arith.constant 0.000000e+00 : f32
    %143 = vector.broadcast %cst_53 : f32 to vector<2x32xf32>
    %144 = arith.subf %143, %142 : vector<2x32xf32>
    %145 = math.exp %144 : vector<2x32xf32>
    %cst_54 = arith.constant 1.000000e+00 : f32
    %146 = vector.broadcast %cst_54 : f32 to vector<2x32xf32>
    %147 = arith.addf %146, %145 : vector<2x32xf32>
    %cst_55 = arith.constant 1.000000e+00 : f32
    %148 = vector.broadcast %cst_55 : f32 to vector<2x32xf32>
    %149 = arith.divf %148, %147 : vector<2x32xf32>
    %150 = arith.mulf %139, %117 : vector<2x32xf32>
    %151 = arith.mulf %131, %141 : vector<2x32xf32>
    %152 = arith.addf %150, %151 : vector<2x32xf32>
    %153 = math.tanh %152 : vector<2x32xf32>
    %154 = arith.mulf %149, %153 : vector<2x32xf32>
    %c6 = arith.constant 6 : index
    %c0_56 = arith.constant 0 : index
    %155 = vector.load %arg8[%c6, %c0_56] : memref<16x32xf32, #tpu.memory_space<vmem>>, vector<2x32xf32>
    tpu.vector_store %arg8[%c6, %c0_56], %154 {strides = array<i32>} : memref<16x32xf32, #tpu.memory_space<vmem>>, vector<2x32xf32>,
    %156 = vector.extract_strided_slice %13 {offsets = [8, 0], sizes = [2, 128], strides = [1, 1]} : vector<16x128xf32> to vector<2x128xf32>
    %cst_57 = arith.constant dense<0.000000e+00> : vector<2x128xf32>
    %157 = tpu.matmul %154, %9, %cst_57 {dimension_numbers = #tpu.dot_dimension_numbers<[1], [0], [0], [1], [0, 0, 1, 1], [], []>} : vector<2x32xf32>, vector<32x128xf32>, vector<2x128xf32> -> vector<2x128xf32>
    %158 = arith.addf %156, %157 : vector<2x128xf32>
    %159 = vector.extract_strided_slice %158 {offsets = [0, 0], sizes = [2, 32], strides = [1, 1]} : vector<2x128xf32> to vector<2x32xf32>
    %cst_58 = arith.constant 0.000000e+00 : f32
    %160 = vector.broadcast %cst_58 : f32 to vector<2x32xf32>
    %161 = arith.subf %160, %159 : vector<2x32xf32>
    %162 = math.exp %161 : vector<2x32xf32>
    %cst_59 = arith.constant 1.000000e+00 : f32
    %163 = vector.broadcast %cst_59 : f32 to vector<2x32xf32>
    %164 = arith.addf %163, %162 : vector<2x32xf32>
    %cst_60 = arith.constant 1.000000e+00 : f32
    %165 = vector.broadcast %cst_60 : f32 to vector<2x32xf32>
    %166 = arith.divf %165, %164 : vector<2x32xf32>
    %167 = vector.extract_strided_slice %158 {offsets = [0, 32], sizes = [2, 32], strides = [1, 1]} : vector<2x128xf32> to vector<2x32xf32>
    %cst_61 = arith.constant 0.000000e+00 : f32
    %168 = vector.broadcast %cst_61 : f32 to vector<2x32xf32>
    %169 = arith.subf %168, %167 : vector<2x32xf32>
    %170 = math.exp %169 : vector<2x32xf32>
    %cst_62 = arith.constant 1.000000e+00 : f32
    %171 = vector.broadcast %cst_62 : f32 to vector<2x32xf32>
    %172 = arith.addf %171, %170 : vector<2x32xf32>
    %cst_63 = arith.constant 1.000000e+00 : f32
    %173 = vector.broadcast %cst_63 : f32 to vector<2x32xf32>
    %174 = arith.divf %173, %172 : vector<2x32xf32>
    %175 = vector.extract_strided_slice %158 {offsets = [0, 64], sizes = [2, 32], strides = [1, 1]} : vector<2x128xf32> to vector<2x32xf32>
    %176 = math.tanh %175 : vector<2x32xf32>
    %177 = vector.extract_strided_slice %158 {offsets = [0, 96], sizes = [2, 32], strides = [1, 1]} : vector<2x128xf32> to vector<2x32xf32>
    %cst_64 = arith.constant 0.000000e+00 : f32
    %178 = vector.broadcast %cst_64 : f32 to vector<2x32xf32>
    %179 = arith.subf %178, %177 : vector<2x32xf32>
    %180 = math.exp %179 : vector<2x32xf32>
    %cst_65 = arith.constant 1.000000e+00 : f32
    %181 = vector.broadcast %cst_65 : f32 to vector<2x32xf32>
    %182 = arith.addf %181, %180 : vector<2x32xf32>
    %cst_66 = arith.constant 1.000000e+00 : f32
    %183 = vector.broadcast %cst_66 : f32 to vector<2x32xf32>
    %184 = arith.divf %183, %182 : vector<2x32xf32>
    %185 = arith.mulf %174, %152 : vector<2x32xf32>
    %186 = arith.mulf %166, %176 : vector<2x32xf32>
    %187 = arith.addf %185, %186 : vector<2x32xf32>
    %188 = math.tanh %187 : vector<2x32xf32>
    %189 = arith.mulf %184, %188 : vector<2x32xf32>
    %c8 = arith.constant 8 : index
    %c0_67 = arith.constant 0 : index
    %190 = vector.load %arg8[%c8, %c0_67] : memref<16x32xf32, #tpu.memory_space<vmem>>, vector<2x32xf32>
    tpu.vector_store %arg8[%c8, %c0_67], %189 {strides = array<i32>} : memref<16x32xf32, #tpu.memory_space<vmem>>, vector<2x32xf32>,
    %191 = vector.extract_strided_slice %13 {offsets = [10, 0], sizes = [2, 128], strides = [1, 1]} : vector<16x128xf32> to vector<2x128xf32>
    %cst_68 = arith.constant dense<0.000000e+00> : vector<2x128xf32>
    %192 = tpu.matmul %189, %9, %cst_68 {dimension_numbers = #tpu.dot_dimension_numbers<[1], [0], [0], [1], [0, 0, 1, 1], [], []>} : vector<2x32xf32>, vector<32x128xf32>, vector<2x128xf32> -> vector<2x128xf32>
    %193 = arith.addf %191, %192 : vector<2x128xf32>
    %194 = vector.extract_strided_slice %193 {offsets = [0, 0], sizes = [2, 32], strides = [1, 1]} : vector<2x128xf32> to vector<2x32xf32>
    %cst_69 = arith.constant 0.000000e+00 : f32
    %195 = vector.broadcast %cst_69 : f32 to vector<2x32xf32>
    %196 = arith.subf %195, %194 : vector<2x32xf32>
    %197 = math.exp %196 : vector<2x32xf32>
    %cst_70 = arith.constant 1.000000e+00 : f32
    %198 = vector.broadcast %cst_70 : f32 to vector<2x32xf32>
    %199 = arith.addf %198, %197 : vector<2x32xf32>
    %cst_71 = arith.constant 1.000000e+00 : f32
    %200 = vector.broadcast %cst_71 : f32 to vector<2x32xf32>
    %201 = arith.divf %200, %199 : vector<2x32xf32>
    %202 = vector.extract_strided_slice %193 {offsets = [0, 32], sizes = [2, 32], strides = [1, 1]} : vector<2x128xf32> to vector<2x32xf32>
    %cst_72 = arith.constant 0.000000e+00 : f32
    %203 = vector.broadcast %cst_72 : f32 to vector<2x32xf32>
    %204 = arith.subf %203, %202 : vector<2x32xf32>
    %205 = math.exp %204 : vector<2x32xf32>
    %cst_73 = arith.constant 1.000000e+00 : f32
    %206 = vector.broadcast %cst_73 : f32 to vector<2x32xf32>
    %207 = arith.addf %206, %205 : vector<2x32xf32>
    %cst_74 = arith.constant 1.000000e+00 : f32
    %208 = vector.broadcast %cst_74 : f32 to vector<2x32xf32>
    %209 = arith.divf %208, %207 : vector<2x32xf32>
    %210 = vector.extract_strided_slice %193 {offsets = [0, 64], sizes = [2, 32], strides = [1, 1]} : vector<2x128xf32> to vector<2x32xf32>
    %211 = math.tanh %210 : vector<2x32xf32>
    %212 = vector.extract_strided_slice %193 {offsets = [0, 96], sizes = [2, 32], strides = [1, 1]} : vector<2x128xf32> to vector<2x32xf32>
    %cst_75 = arith.constant 0.000000e+00 : f32
    %213 = vector.broadcast %cst_75 : f32 to vector<2x32xf32>
    %214 = arith.subf %213, %212 : vector<2x32xf32>
    %215 = math.exp %214 : vector<2x32xf32>
    %cst_76 = arith.constant 1.000000e+00 : f32
    %216 = vector.broadcast %cst_76 : f32 to vector<2x32xf32>
    %217 = arith.addf %216, %215 : vector<2x32xf32>
    %cst_77 = arith.constant 1.000000e+00 : f32
    %218 = vector.broadcast %cst_77 : f32 to vector<2x32xf32>
    %219 = arith.divf %218, %217 : vector<2x32xf32>
    %220 = arith.mulf %209, %187 : vector<2x32xf32>
    %221 = arith.mulf %201, %211 : vector<2x32xf32>
    %222 = arith.addf %220, %221 : vector<2x32xf32>
    %223 = math.tanh %222 : vector<2x32xf32>
    %224 = arith.mulf %219, %223 : vector<2x32xf32>
    %c10 = arith.constant 10 : index
    %c0_78 = arith.constant 0 : index
    %225 = vector.load %arg8[%c10, %c0_78] : memref<16x32xf32, #tpu.memory_space<vmem>>, vector<2x32xf32>
    tpu.vector_store %arg8[%c10, %c0_78], %224 {strides = array<i32>} : memref<16x32xf32, #tpu.memory_space<vmem>>, vector<2x32xf32>,
    %226 = vector.extract_strided_slice %13 {offsets = [12, 0], sizes = [2, 128], strides = [1, 1]} : vector<16x128xf32> to vector<2x128xf32>
    %cst_79 = arith.constant dense<0.000000e+00> : vector<2x128xf32>
    %227 = tpu.matmul %224, %9, %cst_79 {dimension_numbers = #tpu.dot_dimension_numbers<[1], [0], [0], [1], [0, 0, 1, 1], [], []>} : vector<2x32xf32>, vector<32x128xf32>, vector<2x128xf32> -> vector<2x128xf32>
    %228 = arith.addf %226, %227 : vector<2x128xf32>
    %229 = vector.extract_strided_slice %228 {offsets = [0, 0], sizes = [2, 32], strides = [1, 1]} : vector<2x128xf32> to vector<2x32xf32>
    %cst_80 = arith.constant 0.000000e+00 : f32
    %230 = vector.broadcast %cst_80 : f32 to vector<2x32xf32>
    %231 = arith.subf %230, %229 : vector<2x32xf32>
    %232 = math.exp %231 : vector<2x32xf32>
    %cst_81 = arith.constant 1.000000e+00 : f32
    %233 = vector.broadcast %cst_81 : f32 to vector<2x32xf32>
    %234 = arith.addf %233, %232 : vector<2x32xf32>
    %cst_82 = arith.constant 1.000000e+00 : f32
    %235 = vector.broadcast %cst_82 : f32 to vector<2x32xf32>
    %236 = arith.divf %235, %234 : vector<2x32xf32>
    %237 = vector.extract_strided_slice %228 {offsets = [0, 32], sizes = [2, 32], strides = [1, 1]} : vector<2x128xf32> to vector<2x32xf32>
    %cst_83 = arith.constant 0.000000e+00 : f32
    %238 = vector.broadcast %cst_83 : f32 to vector<2x32xf32>
    %239 = arith.subf %238, %237 : vector<2x32xf32>
    %240 = math.exp %239 : vector<2x32xf32>
    %cst_84 = arith.constant 1.000000e+00 : f32
    %241 = vector.broadcast %cst_84 : f32 to vector<2x32xf32>
    %242 = arith.addf %241, %240 : vector<2x32xf32>
    %cst_85 = arith.constant 1.000000e+00 : f32
    %243 = vector.broadcast %cst_85 : f32 to vector<2x32xf32>
    %244 = arith.divf %243, %242 : vector<2x32xf32>
    %245 = vector.extract_strided_slice %228 {offsets = [0, 64], sizes = [2, 32], strides = [1, 1]} : vector<2x128xf32> to vector<2x32xf32>
    %246 = math.tanh %245 : vector<2x32xf32>
    %247 = vector.extract_strided_slice %228 {offsets = [0, 96], sizes = [2, 32], strides = [1, 1]} : vector<2x128xf32> to vector<2x32xf32>
    %cst_86 = arith.constant 0.000000e+00 : f32
    %248 = vector.broadcast %cst_86 : f32 to vector<2x32xf32>
    %249 = arith.subf %248, %247 : vector<2x32xf32>
    %250 = math.exp %249 : vector<2x32xf32>
    %cst_87 = arith.constant 1.000000e+00 : f32
    %251 = vector.broadcast %cst_87 : f32 to vector<2x32xf32>
    %252 = arith.addf %251, %250 : vector<2x32xf32>
    %cst_88 = arith.constant 1.000000e+00 : f32
    %253 = vector.broadcast %cst_88 : f32 to vector<2x32xf32>
    %254 = arith.divf %253, %252 : vector<2x32xf32>
    %255 = arith.mulf %244, %222 : vector<2x32xf32>
    %256 = arith.mulf %236, %246 : vector<2x32xf32>
    %257 = arith.addf %255, %256 : vector<2x32xf32>
    %258 = math.tanh %257 : vector<2x32xf32>
    %259 = arith.mulf %254, %258 : vector<2x32xf32>
    %c12 = arith.constant 12 : index
    %c0_89 = arith.constant 0 : index
    %260 = vector.load %arg8[%c12, %c0_89] : memref<16x32xf32, #tpu.memory_space<vmem>>, vector<2x32xf32>
    tpu.vector_store %arg8[%c12, %c0_89], %259 {strides = array<i32>} : memref<16x32xf32, #tpu.memory_space<vmem>>, vector<2x32xf32>,
    %261 = vector.extract_strided_slice %13 {offsets = [14, 0], sizes = [2, 128], strides = [1, 1]} : vector<16x128xf32> to vector<2x128xf32>
    %cst_90 = arith.constant dense<0.000000e+00> : vector<2x128xf32>
    %262 = tpu.matmul %259, %9, %cst_90 {dimension_numbers = #tpu.dot_dimension_numbers<[1], [0], [0], [1], [0, 0, 1, 1], [], []>} : vector<2x32xf32>, vector<32x128xf32>, vector<2x128xf32> -> vector<2x128xf32>
    %263 = arith.addf %261, %262 : vector<2x128xf32>
    %264 = vector.extract_strided_slice %263 {offsets = [0, 0], sizes = [2, 32], strides = [1, 1]} : vector<2x128xf32> to vector<2x32xf32>
    %cst_91 = arith.constant 0.000000e+00 : f32
    %265 = vector.broadcast %cst_91 : f32 to vector<2x32xf32>
    %266 = arith.subf %265, %264 : vector<2x32xf32>
    %267 = math.exp %266 : vector<2x32xf32>
    %cst_92 = arith.constant 1.000000e+00 : f32
    %268 = vector.broadcast %cst_92 : f32 to vector<2x32xf32>
    %269 = arith.addf %268, %267 : vector<2x32xf32>
    %cst_93 = arith.constant 1.000000e+00 : f32
    %270 = vector.broadcast %cst_93 : f32 to vector<2x32xf32>
    %271 = arith.divf %270, %269 : vector<2x32xf32>
    %272 = vector.extract_strided_slice %263 {offsets = [0, 32], sizes = [2, 32], strides = [1, 1]} : vector<2x128xf32> to vector<2x32xf32>
    %cst_94 = arith.constant 0.000000e+00 : f32
    %273 = vector.broadcast %cst_94 : f32 to vector<2x32xf32>
    %274 = arith.subf %273, %272 : vector<2x32xf32>
    %275 = math.exp %274 : vector<2x32xf32>
    %cst_95 = arith.constant 1.000000e+00 : f32
    %276 = vector.broadcast %cst_95 : f32 to vector<2x32xf32>
    %277 = arith.addf %276, %275 : vector<2x32xf32>
    %cst_96 = arith.constant 1.000000e+00 : f32
    %278 = vector.broadcast %cst_96 : f32 to vector<2x32xf32>
    %279 = arith.divf %278, %277 : vector<2x32xf32>
    %280 = vector.extract_strided_slice %263 {offsets = [0, 64], sizes = [2, 32], strides = [1, 1]} : vector<2x128xf32> to vector<2x32xf32>
    %281 = math.tanh %280 : vector<2x32xf32>
    %282 = vector.extract_strided_slice %263 {offsets = [0, 96], sizes = [2, 32], strides = [1, 1]} : vector<2x128xf32> to vector<2x32xf32>
    %cst_97 = arith.constant 0.000000e+00 : f32
    %283 = vector.broadcast %cst_97 : f32 to vector<2x32xf32>
    %284 = arith.subf %283, %282 : vector<2x32xf32>
    %285 = math.exp %284 : vector<2x32xf32>
    %cst_98 = arith.constant 1.000000e+00 : f32
    %286 = vector.broadcast %cst_98 : f32 to vector<2x32xf32>
    %287 = arith.addf %286, %285 : vector<2x32xf32>
    %cst_99 = arith.constant 1.000000e+00 : f32
    %288 = vector.broadcast %cst_99 : f32 to vector<2x32xf32>
    %289 = arith.divf %288, %287 : vector<2x32xf32>
    %290 = arith.mulf %279, %257 : vector<2x32xf32>
    %291 = arith.mulf %271, %281 : vector<2x32xf32>
    %292 = arith.addf %290, %291 : vector<2x32xf32>
    %293 = math.tanh %292 : vector<2x32xf32>
    %294 = arith.mulf %289, %293 : vector<2x32xf32>
    %c14 = arith.constant 14 : index
    %c0_100 = arith.constant 0 : index
    %295 = vector.load %arg8[%c14, %c0_100] : memref<16x32xf32, #tpu.memory_space<vmem>>, vector<2x32xf32>
    tpu.vector_store %arg8[%c14, %c0_100], %294 {strides = array<i32>} : memref<16x32xf32, #tpu.memory_space<vmem>>, vector<2x32xf32>,
    %c0_101 = arith.constant 0 : index
    %c0_102 = arith.constant 0 : index
    %c0_103 = arith.constant 0 : index
    %296 = vector.load %arg9[%c0_101, %c0_102, %c0_103] : memref<2x2x32xf32, #tpu.memory_space<vmem>>, vector<1x2x32xf32>
    %297 = vector.shape_cast %296 : vector<1x2x32xf32> to vector<2x32xf32>
    %298 = vector.shape_cast %294 : vector<2x32xf32> to vector<1x2x32xf32>
    tpu.vector_store %arg9[%c0_101, %c0_102, %c0_103], %298 {strides = array<i32>} : memref<2x2x32xf32, #tpu.memory_space<vmem>>, vector<1x2x32xf32>,
    %c0_104 = arith.constant 0 : index
    %c0_105 = arith.constant 0 : index
    %c0_106 = arith.constant 0 : index
    %299 = vector.load %arg10[%c0_104, %c0_105, %c0_106] : memref<2x2x32xf32, #tpu.memory_space<vmem>>, vector<1x2x32xf32>
    %300 = vector.shape_cast %299 : vector<1x2x32xf32> to vector<2x32xf32>
    %301 = vector.shape_cast %292 : vector<2x32xf32> to vector<1x2x32xf32>
    tpu.vector_store %arg10[%c0_104, %c0_105, %c0_106], %301 {strides = array<i32>} : memref<2x2x32xf32, #tpu.memory_space<vmem>>, vector<1x2x32xf32>,
    %c0_107 = arith.constant 0 : index
    %c0_108 = arith.constant 0 : index
    %302 = vector.load %arg8[%c0_107, %c0_108] : memref<16x32xf32, #tpu.memory_space<vmem>>, vector<16x32xf32>
    %c0_109 = arith.constant 0 : index
    %c0_110 = arith.constant 0 : index
    %303 = vector.load %arg5[%c0_109, %c0_110] : memref<32x128xf32, #tpu.memory_space<vmem>>, vector<32x128xf32>
    %c0_111 = arith.constant 0 : index
    %c0_112 = arith.constant 0 : index
    %304 = vector.load %arg6[%c0_111, %c0_112] : memref<32x128xf32, #tpu.memory_space<vmem>>, vector<32x128xf32>
    %c0_113 = arith.constant 0 : index
    %c0_114 = arith.constant 0 : index
    %305 = vector.load %arg7[%c0_113, %c0_114] : memref<1x128xf32, #tpu.memory_space<vmem>>, vector<1x128xf32>
    %cst_115 = arith.constant dense<0.000000e+00> : vector<16x128xf32>
    %306 = tpu.matmul %302, %303, %cst_115 {dimension_numbers = #tpu.dot_dimension_numbers<[1], [0], [0], [1], [0, 0, 1, 1], [], []>} : vector<16x32xf32>, vector<32x128xf32>, vector<16x128xf32> -> vector<16x128xf32>
    %307 = vector.broadcast %305 : vector<1x128xf32> to vector<16x128xf32>
    %308 = arith.addf %306, %307 : vector<16x128xf32>
    %cst_116 = arith.constant 0.000000e+00 : f32
    %309 = vector.broadcast %cst_116 : f32 to vector<2x32xf32>
    %cst_117 = arith.constant 0.000000e+00 : f32
    %310 = vector.broadcast %cst_117 : f32 to vector<2x32xf32>
    %311 = vector.extract_strided_slice %308 {offsets = [0, 0], sizes = [2, 128], strides = [1, 1]} : vector<16x128xf32> to vector<2x128xf32>
    %cst_118 = arith.constant dense<0.000000e+00> : vector<2x128xf32>
    %312 = tpu.matmul %309, %304, %cst_118 {dimension_numbers = #tpu.dot_dimension_numbers<[1], [0], [0], [1], [0, 0, 1, 1], [], []>} : vector<2x32xf32>, vector<32x128xf32>, vector<2x128xf32> -> vector<2x128xf32>
    %313 = arith.addf %311, %312 : vector<2x128xf32>
    %314 = vector.extract_strided_slice %313 {offsets = [0, 0], sizes = [2, 32], strides = [1, 1]} : vector<2x128xf32> to vector<2x32xf32>
    %cst_119 = arith.constant 0.000000e+00 : f32
    %315 = vector.broadcast %cst_119 : f32 to vector<2x32xf32>
    %316 = arith.subf %315, %314 : vector<2x32xf32>
    %317 = math.exp %316 : vector<2x32xf32>
    %cst_120 = arith.constant 1.000000e+00 : f32
    %318 = vector.broadcast %cst_120 : f32 to vector<2x32xf32>
    %319 = arith.addf %318, %317 : vector<2x32xf32>
    %cst_121 = arith.constant 1.000000e+00 : f32
    %320 = vector.broadcast %cst_121 : f32 to vector<2x32xf32>
    %321 = arith.divf %320, %319 : vector<2x32xf32>
    %322 = vector.extract_strided_slice %313 {offsets = [0, 32], sizes = [2, 32], strides = [1, 1]} : vector<2x128xf32> to vector<2x32xf32>
    %cst_122 = arith.constant 0.000000e+00 : f32
    %323 = vector.broadcast %cst_122 : f32 to vector<2x32xf32>
    %324 = arith.subf %323, %322 : vector<2x32xf32>
    %325 = math.exp %324 : vector<2x32xf32>
    %cst_123 = arith.constant 1.000000e+00 : f32
    %326 = vector.broadcast %cst_123 : f32 to vector<2x32xf32>
    %327 = arith.addf %326, %325 : vector<2x32xf32>
    %cst_124 = arith.constant 1.000000e+00 : f32
    %328 = vector.broadcast %cst_124 : f32 to vector<2x32xf32>
    %329 = arith.divf %328, %327 : vector<2x32xf32>
    %330 = vector.extract_strided_slice %313 {offsets = [0, 64], sizes = [2, 32], strides = [1, 1]} : vector<2x128xf32> to vector<2x32xf32>
    %331 = math.tanh %330 : vector<2x32xf32>
    %332 = vector.extract_strided_slice %313 {offsets = [0, 96], sizes = [2, 32], strides = [1, 1]} : vector<2x128xf32> to vector<2x32xf32>
    %cst_125 = arith.constant 0.000000e+00 : f32
    %333 = vector.broadcast %cst_125 : f32 to vector<2x32xf32>
    %334 = arith.subf %333, %332 : vector<2x32xf32>
    %335 = math.exp %334 : vector<2x32xf32>
    %cst_126 = arith.constant 1.000000e+00 : f32
    %336 = vector.broadcast %cst_126 : f32 to vector<2x32xf32>
    %337 = arith.addf %336, %335 : vector<2x32xf32>
    %cst_127 = arith.constant 1.000000e+00 : f32
    %338 = vector.broadcast %cst_127 : f32 to vector<2x32xf32>
    %339 = arith.divf %338, %337 : vector<2x32xf32>
    %340 = arith.mulf %329, %310 : vector<2x32xf32>
    %341 = arith.mulf %321, %331 : vector<2x32xf32>
    %342 = arith.addf %340, %341 : vector<2x32xf32>
    %343 = math.tanh %342 : vector<2x32xf32>
    %344 = arith.mulf %339, %343 : vector<2x32xf32>
    %c0_128 = arith.constant 0 : index
    %c0_129 = arith.constant 0 : index
    %345 = vector.load %arg8[%c0_128, %c0_129] : memref<16x32xf32, #tpu.memory_space<vmem>>, vector<2x32xf32>
    tpu.vector_store %arg8[%c0_128, %c0_129], %344 {strides = array<i32>} : memref<16x32xf32, #tpu.memory_space<vmem>>, vector<2x32xf32>,
    %346 = vector.extract_strided_slice %308 {offsets = [2, 0], sizes = [2, 128], strides = [1, 1]} : vector<16x128xf32> to vector<2x128xf32>
    %cst_130 = arith.constant dense<0.000000e+00> : vector<2x128xf32>
    %347 = tpu.matmul %344, %304, %cst_130 {dimension_numbers = #tpu.dot_dimension_numbers<[1], [0], [0], [1], [0, 0, 1, 1], [], []>} : vector<2x32xf32>, vector<32x128xf32>, vector<2x128xf32> -> vector<2x128xf32>
    %348 = arith.addf %346, %347 : vector<2x128xf32>
    %349 = vector.extract_strided_slice %348 {offsets = [0, 0], sizes = [2, 32], strides = [1, 1]} : vector<2x128xf32> to vector<2x32xf32>
    %cst_131 = arith.constant 0.000000e+00 : f32
    %350 = vector.broadcast %cst_131 : f32 to vector<2x32xf32>
    %351 = arith.subf %350, %349 : vector<2x32xf32>
    %352 = math.exp %351 : vector<2x32xf32>
    %cst_132 = arith.constant 1.000000e+00 : f32
    %353 = vector.broadcast %cst_132 : f32 to vector<2x32xf32>
    %354 = arith.addf %353, %352 : vector<2x32xf32>
    %cst_133 = arith.constant 1.000000e+00 : f32
    %355 = vector.broadcast %cst_133 : f32 to vector<2x32xf32>
    %356 = arith.divf %355, %354 : vector<2x32xf32>
    %357 = vector.extract_strided_slice %348 {offsets = [0, 32], sizes = [2, 32], strides = [1, 1]} : vector<2x128xf32> to vector<2x32xf32>
    %cst_134 = arith.constant 0.000000e+00 : f32
    %358 = vector.broadcast %cst_134 : f32 to vector<2x32xf32>
    %359 = arith.subf %358, %357 : vector<2x32xf32>
    %360 = math.exp %359 : vector<2x32xf32>
    %cst_135 = arith.constant 1.000000e+00 : f32
    %361 = vector.broadcast %cst_135 : f32 to vector<2x32xf32>
    %362 = arith.addf %361, %360 : vector<2x32xf32>
    %cst_136 = arith.constant 1.000000e+00 : f32
    %363 = vector.broadcast %cst_136 : f32 to vector<2x32xf32>
    %364 = arith.divf %363, %362 : vector<2x32xf32>
    %365 = vector.extract_strided_slice %348 {offsets = [0, 64], sizes = [2, 32], strides = [1, 1]} : vector<2x128xf32> to vector<2x32xf32>
    %366 = math.tanh %365 : vector<2x32xf32>
    %367 = vector.extract_strided_slice %348 {offsets = [0, 96], sizes = [2, 32], strides = [1, 1]} : vector<2x128xf32> to vector<2x32xf32>
    %cst_137 = arith.constant 0.000000e+00 : f32
    %368 = vector.broadcast %cst_137 : f32 to vector<2x32xf32>
    %369 = arith.subf %368, %367 : vector<2x32xf32>
    %370 = math.exp %369 : vector<2x32xf32>
    %cst_138 = arith.constant 1.000000e+00 : f32
    %371 = vector.broadcast %cst_138 : f32 to vector<2x32xf32>
    %372 = arith.addf %371, %370 : vector<2x32xf32>
    %cst_139 = arith.constant 1.000000e+00 : f32
    %373 = vector.broadcast %cst_139 : f32 to vector<2x32xf32>
    %374 = arith.divf %373, %372 : vector<2x32xf32>
    %375 = arith.mulf %364, %342 : vector<2x32xf32>
    %376 = arith.mulf %356, %366 : vector<2x32xf32>
    %377 = arith.addf %375, %376 : vector<2x32xf32>
    %378 = math.tanh %377 : vector<2x32xf32>
    %379 = arith.mulf %374, %378 : vector<2x32xf32>
    %c2_140 = arith.constant 2 : index
    %c0_141 = arith.constant 0 : index
    %380 = vector.load %arg8[%c2_140, %c0_141] : memref<16x32xf32, #tpu.memory_space<vmem>>, vector<2x32xf32>
    tpu.vector_store %arg8[%c2_140, %c0_141], %379 {strides = array<i32>} : memref<16x32xf32, #tpu.memory_space<vmem>>, vector<2x32xf32>,
    %381 = vector.extract_strided_slice %308 {offsets = [4, 0], sizes = [2, 128], strides = [1, 1]} : vector<16x128xf32> to vector<2x128xf32>
    %cst_142 = arith.constant dense<0.000000e+00> : vector<2x128xf32>
    %382 = tpu.matmul %379, %304, %cst_142 {dimension_numbers = #tpu.dot_dimension_numbers<[1], [0], [0], [1], [0, 0, 1, 1], [], []>} : vector<2x32xf32>, vector<32x128xf32>, vector<2x128xf32> -> vector<2x128xf32>
    %383 = arith.addf %381, %382 : vector<2x128xf32>
    %384 = vector.extract_strided_slice %383 {offsets = [0, 0], sizes = [2, 32], strides = [1, 1]} : vector<2x128xf32> to vector<2x32xf32>
    %cst_143 = arith.constant 0.000000e+00 : f32
    %385 = vector.broadcast %cst_143 : f32 to vector<2x32xf32>
    %386 = arith.subf %385, %384 : vector<2x32xf32>
    %387 = math.exp %386 : vector<2x32xf32>
    %cst_144 = arith.constant 1.000000e+00 : f32
    %388 = vector.broadcast %cst_144 : f32 to vector<2x32xf32>
    %389 = arith.addf %388, %387 : vector<2x32xf32>
    %cst_145 = arith.constant 1.000000e+00 : f32
    %390 = vector.broadcast %cst_145 : f32 to vector<2x32xf32>
    %391 = arith.divf %390, %389 : vector<2x32xf32>
    %392 = vector.extract_strided_slice %383 {offsets = [0, 32], sizes = [2, 32], strides = [1, 1]} : vector<2x128xf32> to vector<2x32xf32>
    %cst_146 = arith.constant 0.000000e+00 : f32
    %393 = vector.broadcast %cst_146 : f32 to vector<2x32xf32>
    %394 = arith.subf %393, %392 : vector<2x32xf32>
    %395 = math.exp %394 : vector<2x32xf32>
    %cst_147 = arith.constant 1.000000e+00 : f32
    %396 = vector.broadcast %cst_147 : f32 to vector<2x32xf32>
    %397 = arith.addf %396, %395 : vector<2x32xf32>
    %cst_148 = arith.constant 1.000000e+00 : f32
    %398 = vector.broadcast %cst_148 : f32 to vector<2x32xf32>
    %399 = arith.divf %398, %397 : vector<2x32xf32>
    %400 = vector.extract_strided_slice %383 {offsets = [0, 64], sizes = [2, 32], strides = [1, 1]} : vector<2x128xf32> to vector<2x32xf32>
    %401 = math.tanh %400 : vector<2x32xf32>
    %402 = vector.extract_strided_slice %383 {offsets = [0, 96], sizes = [2, 32], strides = [1, 1]} : vector<2x128xf32> to vector<2x32xf32>
    %cst_149 = arith.constant 0.000000e+00 : f32
    %403 = vector.broadcast %cst_149 : f32 to vector<2x32xf32>
    %404 = arith.subf %403, %402 : vector<2x32xf32>
    %405 = math.exp %404 : vector<2x32xf32>
    %cst_150 = arith.constant 1.000000e+00 : f32
    %406 = vector.broadcast %cst_150 : f32 to vector<2x32xf32>
    %407 = arith.addf %406, %405 : vector<2x32xf32>
    %cst_151 = arith.constant 1.000000e+00 : f32
    %408 = vector.broadcast %cst_151 : f32 to vector<2x32xf32>
    %409 = arith.divf %408, %407 : vector<2x32xf32>
    %410 = arith.mulf %399, %377 : vector<2x32xf32>
    %411 = arith.mulf %391, %401 : vector<2x32xf32>
    %412 = arith.addf %410, %411 : vector<2x32xf32>
    %413 = math.tanh %412 : vector<2x32xf32>
    %414 = arith.mulf %409, %413 : vector<2x32xf32>
    %c4_152 = arith.constant 4 : index
    %c0_153 = arith.constant 0 : index
    %415 = vector.load %arg8[%c4_152, %c0_153] : memref<16x32xf32, #tpu.memory_space<vmem>>, vector<2x32xf32>
    tpu.vector_store %arg8[%c4_152, %c0_153], %414 {strides = array<i32>} : memref<16x32xf32, #tpu.memory_space<vmem>>, vector<2x32xf32>,
    %416 = vector.extract_strided_slice %308 {offsets = [6, 0], sizes = [2, 128], strides = [1, 1]} : vector<16x128xf32> to vector<2x128xf32>
    %cst_154 = arith.constant dense<0.000000e+00> : vector<2x128xf32>
    %417 = tpu.matmul %414, %304, %cst_154 {dimension_numbers = #tpu.dot_dimension_numbers<[1], [0], [0], [1], [0, 0, 1, 1], [], []>} : vector<2x32xf32>, vector<32x128xf32>, vector<2x128xf32> -> vector<2x128xf32>
    %418 = arith.addf %416, %417 : vector<2x128xf32>
    %419 = vector.extract_strided_slice %418 {offsets = [0, 0], sizes = [2, 32], strides = [1, 1]} : vector<2x128xf32> to vector<2x32xf32>
    %cst_155 = arith.constant 0.000000e+00 : f32
    %420 = vector.broadcast %cst_155 : f32 to vector<2x32xf32>
    %421 = arith.subf %420, %419 : vector<2x32xf32>
    %422 = math.exp %421 : vector<2x32xf32>
    %cst_156 = arith.constant 1.000000e+00 : f32
    %423 = vector.broadcast %cst_156 : f32 to vector<2x32xf32>
    %424 = arith.addf %423, %422 : vector<2x32xf32>
    %cst_157 = arith.constant 1.000000e+00 : f32
    %425 = vector.broadcast %cst_157 : f32 to vector<2x32xf32>
    %426 = arith.divf %425, %424 : vector<2x32xf32>
    %427 = vector.extract_strided_slice %418 {offsets = [0, 32], sizes = [2, 32], strides = [1, 1]} : vector<2x128xf32> to vector<2x32xf32>
    %cst_158 = arith.constant 0.000000e+00 : f32
    %428 = vector.broadcast %cst_158 : f32 to vector<2x32xf32>
    %429 = arith.subf %428, %427 : vector<2x32xf32>
    %430 = math.exp %429 : vector<2x32xf32>
    %cst_159 = arith.constant 1.000000e+00 : f32
    %431 = vector.broadcast %cst_159 : f32 to vector<2x32xf32>
    %432 = arith.addf %431, %430 : vector<2x32xf32>
    %cst_160 = arith.constant 1.000000e+00 : f32
    %433 = vector.broadcast %cst_160 : f32 to vector<2x32xf32>
    %434 = arith.divf %433, %432 : vector<2x32xf32>
    %435 = vector.extract_strided_slice %418 {offsets = [0, 64], sizes = [2, 32], strides = [1, 1]} : vector<2x128xf32> to vector<2x32xf32>
    %436 = math.tanh %435 : vector<2x32xf32>
    %437 = vector.extract_strided_slice %418 {offsets = [0, 96], sizes = [2, 32], strides = [1, 1]} : vector<2x128xf32> to vector<2x32xf32>
    %cst_161 = arith.constant 0.000000e+00 : f32
    %438 = vector.broadcast %cst_161 : f32 to vector<2x32xf32>
    %439 = arith.subf %438, %437 : vector<2x32xf32>
    %440 = math.exp %439 : vector<2x32xf32>
    %cst_162 = arith.constant 1.000000e+00 : f32
    %441 = vector.broadcast %cst_162 : f32 to vector<2x32xf32>
    %442 = arith.addf %441, %440 : vector<2x32xf32>
    %cst_163 = arith.constant 1.000000e+00 : f32
    %443 = vector.broadcast %cst_163 : f32 to vector<2x32xf32>
    %444 = arith.divf %443, %442 : vector<2x32xf32>
    %445 = arith.mulf %434, %412 : vector<2x32xf32>
    %446 = arith.mulf %426, %436 : vector<2x32xf32>
    %447 = arith.addf %445, %446 : vector<2x32xf32>
    %448 = math.tanh %447 : vector<2x32xf32>
    %449 = arith.mulf %444, %448 : vector<2x32xf32>
    %c6_164 = arith.constant 6 : index
    %c0_165 = arith.constant 0 : index
    %450 = vector.load %arg8[%c6_164, %c0_165] : memref<16x32xf32, #tpu.memory_space<vmem>>, vector<2x32xf32>
    tpu.vector_store %arg8[%c6_164, %c0_165], %449 {strides = array<i32>} : memref<16x32xf32, #tpu.memory_space<vmem>>, vector<2x32xf32>,
    %451 = vector.extract_strided_slice %308 {offsets = [8, 0], sizes = [2, 128], strides = [1, 1]} : vector<16x128xf32> to vector<2x128xf32>
    %cst_166 = arith.constant dense<0.000000e+00> : vector<2x128xf32>
    %452 = tpu.matmul %449, %304, %cst_166 {dimension_numbers = #tpu.dot_dimension_numbers<[1], [0], [0], [1], [0, 0, 1, 1], [], []>} : vector<2x32xf32>, vector<32x128xf32>, vector<2x128xf32> -> vector<2x128xf32>
    %453 = arith.addf %451, %452 : vector<2x128xf32>
    %454 = vector.extract_strided_slice %453 {offsets = [0, 0], sizes = [2, 32], strides = [1, 1]} : vector<2x128xf32> to vector<2x32xf32>
    %cst_167 = arith.constant 0.000000e+00 : f32
    %455 = vector.broadcast %cst_167 : f32 to vector<2x32xf32>
    %456 = arith.subf %455, %454 : vector<2x32xf32>
    %457 = math.exp %456 : vector<2x32xf32>
    %cst_168 = arith.constant 1.000000e+00 : f32
    %458 = vector.broadcast %cst_168 : f32 to vector<2x32xf32>
    %459 = arith.addf %458, %457 : vector<2x32xf32>
    %cst_169 = arith.constant 1.000000e+00 : f32
    %460 = vector.broadcast %cst_169 : f32 to vector<2x32xf32>
    %461 = arith.divf %460, %459 : vector<2x32xf32>
    %462 = vector.extract_strided_slice %453 {offsets = [0, 32], sizes = [2, 32], strides = [1, 1]} : vector<2x128xf32> to vector<2x32xf32>
    %cst_170 = arith.constant 0.000000e+00 : f32
    %463 = vector.broadcast %cst_170 : f32 to vector<2x32xf32>
    %464 = arith.subf %463, %462 : vector<2x32xf32>
    %465 = math.exp %464 : vector<2x32xf32>
    %cst_171 = arith.constant 1.000000e+00 : f32
    %466 = vector.broadcast %cst_171 : f32 to vector<2x32xf32>
    %467 = arith.addf %466, %465 : vector<2x32xf32>
    %cst_172 = arith.constant 1.000000e+00 : f32
    %468 = vector.broadcast %cst_172 : f32 to vector<2x32xf32>
    %469 = arith.divf %468, %467 : vector<2x32xf32>
    %470 = vector.extract_strided_slice %453 {offsets = [0, 64], sizes = [2, 32], strides = [1, 1]} : vector<2x128xf32> to vector<2x32xf32>
    %471 = math.tanh %470 : vector<2x32xf32>
    %472 = vector.extract_strided_slice %453 {offsets = [0, 96], sizes = [2, 32], strides = [1, 1]} : vector<2x128xf32> to vector<2x32xf32>
    %cst_173 = arith.constant 0.000000e+00 : f32
    %473 = vector.broadcast %cst_173 : f32 to vector<2x32xf32>
    %474 = arith.subf %473, %472 : vector<2x32xf32>
    %475 = math.exp %474 : vector<2x32xf32>
    %cst_174 = arith.constant 1.000000e+00 : f32
    %476 = vector.broadcast %cst_174 : f32 to vector<2x32xf32>
    %477 = arith.addf %476, %475 : vector<2x32xf32>
    %cst_175 = arith.constant 1.000000e+00 : f32
    %478 = vector.broadcast %cst_175 : f32 to vector<2x32xf32>
    %479 = arith.divf %478, %477 : vector<2x32xf32>
    %480 = arith.mulf %469, %447 : vector<2x32xf32>
    %481 = arith.mulf %461, %471 : vector<2x32xf32>
    %482 = arith.addf %480, %481 : vector<2x32xf32>
    %483 = math.tanh %482 : vector<2x32xf32>
    %484 = arith.mulf %479, %483 : vector<2x32xf32>
    %c8_176 = arith.constant 8 : index
    %c0_177 = arith.constant 0 : index
    %485 = vector.load %arg8[%c8_176, %c0_177] : memref<16x32xf32, #tpu.memory_space<vmem>>, vector<2x32xf32>
    tpu.vector_store %arg8[%c8_176, %c0_177], %484 {strides = array<i32>} : memref<16x32xf32, #tpu.memory_space<vmem>>, vector<2x32xf32>,
    %486 = vector.extract_strided_slice %308 {offsets = [10, 0], sizes = [2, 128], strides = [1, 1]} : vector<16x128xf32> to vector<2x128xf32>
    %cst_178 = arith.constant dense<0.000000e+00> : vector<2x128xf32>
    %487 = tpu.matmul %484, %304, %cst_178 {dimension_numbers = #tpu.dot_dimension_numbers<[1], [0], [0], [1], [0, 0, 1, 1], [], []>} : vector<2x32xf32>, vector<32x128xf32>, vector<2x128xf32> -> vector<2x128xf32>
    %488 = arith.addf %486, %487 : vector<2x128xf32>
    %489 = vector.extract_strided_slice %488 {offsets = [0, 0], sizes = [2, 32], strides = [1, 1]} : vector<2x128xf32> to vector<2x32xf32>
    %cst_179 = arith.constant 0.000000e+00 : f32
    %490 = vector.broadcast %cst_179 : f32 to vector<2x32xf32>
    %491 = arith.subf %490, %489 : vector<2x32xf32>
    %492 = math.exp %491 : vector<2x32xf32>
    %cst_180 = arith.constant 1.000000e+00 : f32
    %493 = vector.broadcast %cst_180 : f32 to vector<2x32xf32>
    %494 = arith.addf %493, %492 : vector<2x32xf32>
    %cst_181 = arith.constant 1.000000e+00 : f32
    %495 = vector.broadcast %cst_181 : f32 to vector<2x32xf32>
    %496 = arith.divf %495, %494 : vector<2x32xf32>
    %497 = vector.extract_strided_slice %488 {offsets = [0, 32], sizes = [2, 32], strides = [1, 1]} : vector<2x128xf32> to vector<2x32xf32>
    %cst_182 = arith.constant 0.000000e+00 : f32
    %498 = vector.broadcast %cst_182 : f32 to vector<2x32xf32>
    %499 = arith.subf %498, %497 : vector<2x32xf32>
    %500 = math.exp %499 : vector<2x32xf32>
    %cst_183 = arith.constant 1.000000e+00 : f32
    %501 = vector.broadcast %cst_183 : f32 to vector<2x32xf32>
    %502 = arith.addf %501, %500 : vector<2x32xf32>
    %cst_184 = arith.constant 1.000000e+00 : f32
    %503 = vector.broadcast %cst_184 : f32 to vector<2x32xf32>
    %504 = arith.divf %503, %502 : vector<2x32xf32>
    %505 = vector.extract_strided_slice %488 {offsets = [0, 64], sizes = [2, 32], strides = [1, 1]} : vector<2x128xf32> to vector<2x32xf32>
    %506 = math.tanh %505 : vector<2x32xf32>
    %507 = vector.extract_strided_slice %488 {offsets = [0, 96], sizes = [2, 32], strides = [1, 1]} : vector<2x128xf32> to vector<2x32xf32>
    %cst_185 = arith.constant 0.000000e+00 : f32
    %508 = vector.broadcast %cst_185 : f32 to vector<2x32xf32>
    %509 = arith.subf %508, %507 : vector<2x32xf32>
    %510 = math.exp %509 : vector<2x32xf32>
    %cst_186 = arith.constant 1.000000e+00 : f32
    %511 = vector.broadcast %cst_186 : f32 to vector<2x32xf32>
    %512 = arith.addf %511, %510 : vector<2x32xf32>
    %cst_187 = arith.constant 1.000000e+00 : f32
    %513 = vector.broadcast %cst_187 : f32 to vector<2x32xf32>
    %514 = arith.divf %513, %512 : vector<2x32xf32>
    %515 = arith.mulf %504, %482 : vector<2x32xf32>
    %516 = arith.mulf %496, %506 : vector<2x32xf32>
    %517 = arith.addf %515, %516 : vector<2x32xf32>
    %518 = math.tanh %517 : vector<2x32xf32>
    %519 = arith.mulf %514, %518 : vector<2x32xf32>
    %c10_188 = arith.constant 10 : index
    %c0_189 = arith.constant 0 : index
    %520 = vector.load %arg8[%c10_188, %c0_189] : memref<16x32xf32, #tpu.memory_space<vmem>>, vector<2x32xf32>
    tpu.vector_store %arg8[%c10_188, %c0_189], %519 {strides = array<i32>} : memref<16x32xf32, #tpu.memory_space<vmem>>, vector<2x32xf32>,
    %521 = vector.extract_strided_slice %308 {offsets = [12, 0], sizes = [2, 128], strides = [1, 1]} : vector<16x128xf32> to vector<2x128xf32>
    %cst_190 = arith.constant dense<0.000000e+00> : vector<2x128xf32>
    %522 = tpu.matmul %519, %304, %cst_190 {dimension_numbers = #tpu.dot_dimension_numbers<[1], [0], [0], [1], [0, 0, 1, 1], [], []>} : vector<2x32xf32>, vector<32x128xf32>, vector<2x128xf32> -> vector<2x128xf32>
    %523 = arith.addf %521, %522 : vector<2x128xf32>
    %524 = vector.extract_strided_slice %523 {offsets = [0, 0], sizes = [2, 32], strides = [1, 1]} : vector<2x128xf32> to vector<2x32xf32>
    %cst_191 = arith.constant 0.000000e+00 : f32
    %525 = vector.broadcast %cst_191 : f32 to vector<2x32xf32>
    %526 = arith.subf %525, %524 : vector<2x32xf32>
    %527 = math.exp %526 : vector<2x32xf32>
    %cst_192 = arith.constant 1.000000e+00 : f32
    %528 = vector.broadcast %cst_192 : f32 to vector<2x32xf32>
    %529 = arith.addf %528, %527 : vector<2x32xf32>
    %cst_193 = arith.constant 1.000000e+00 : f32
    %530 = vector.broadcast %cst_193 : f32 to vector<2x32xf32>
    %531 = arith.divf %530, %529 : vector<2x32xf32>
    %532 = vector.extract_strided_slice %523 {offsets = [0, 32], sizes = [2, 32], strides = [1, 1]} : vector<2x128xf32> to vector<2x32xf32>
    %cst_194 = arith.constant 0.000000e+00 : f32
    %533 = vector.broadcast %cst_194 : f32 to vector<2x32xf32>
    %534 = arith.subf %533, %532 : vector<2x32xf32>
    %535 = math.exp %534 : vector<2x32xf32>
    %cst_195 = arith.constant 1.000000e+00 : f32
    %536 = vector.broadcast %cst_195 : f32 to vector<2x32xf32>
    %537 = arith.addf %536, %535 : vector<2x32xf32>
    %cst_196 = arith.constant 1.000000e+00 : f32
    %538 = vector.broadcast %cst_196 : f32 to vector<2x32xf32>
    %539 = arith.divf %538, %537 : vector<2x32xf32>
    %540 = vector.extract_strided_slice %523 {offsets = [0, 64], sizes = [2, 32], strides = [1, 1]} : vector<2x128xf32> to vector<2x32xf32>
    %541 = math.tanh %540 : vector<2x32xf32>
    %542 = vector.extract_strided_slice %523 {offsets = [0, 96], sizes = [2, 32], strides = [1, 1]} : vector<2x128xf32> to vector<2x32xf32>
    %cst_197 = arith.constant 0.000000e+00 : f32
    %543 = vector.broadcast %cst_197 : f32 to vector<2x32xf32>
    %544 = arith.subf %543, %542 : vector<2x32xf32>
    %545 = math.exp %544 : vector<2x32xf32>
    %cst_198 = arith.constant 1.000000e+00 : f32
    %546 = vector.broadcast %cst_198 : f32 to vector<2x32xf32>
    %547 = arith.addf %546, %545 : vector<2x32xf32>
    %cst_199 = arith.constant 1.000000e+00 : f32
    %548 = vector.broadcast %cst_199 : f32 to vector<2x32xf32>
    %549 = arith.divf %548, %547 : vector<2x32xf32>
    %550 = arith.mulf %539, %517 : vector<2x32xf32>
    %551 = arith.mulf %531, %541 : vector<2x32xf32>
    %552 = arith.addf %550, %551 : vector<2x32xf32>
    %553 = math.tanh %552 : vector<2x32xf32>
    %554 = arith.mulf %549, %553 : vector<2x32xf32>
    %c12_200 = arith.constant 12 : index
    %c0_201 = arith.constant 0 : index
    %555 = vector.load %arg8[%c12_200, %c0_201] : memref<16x32xf32, #tpu.memory_space<vmem>>, vector<2x32xf32>
    tpu.vector_store %arg8[%c12_200, %c0_201], %554 {strides = array<i32>} : memref<16x32xf32, #tpu.memory_space<vmem>>, vector<2x32xf32>,
    %556 = vector.extract_strided_slice %308 {offsets = [14, 0], sizes = [2, 128], strides = [1, 1]} : vector<16x128xf32> to vector<2x128xf32>
    %cst_202 = arith.constant dense<0.000000e+00> : vector<2x128xf32>
    %557 = tpu.matmul %554, %304, %cst_202 {dimension_numbers = #tpu.dot_dimension_numbers<[1], [0], [0], [1], [0, 0, 1, 1], [], []>} : vector<2x32xf32>, vector<32x128xf32>, vector<2x128xf32> -> vector<2x128xf32>
    %558 = arith.addf %556, %557 : vector<2x128xf32>
    %559 = vector.extract_strided_slice %558 {offsets = [0, 0], sizes = [2, 32], strides = [1, 1]} : vector<2x128xf32> to vector<2x32xf32>
    %cst_203 = arith.constant 0.000000e+00 : f32
    %560 = vector.broadcast %cst_203 : f32 to vector<2x32xf32>
    %561 = arith.subf %560, %559 : vector<2x32xf32>
    %562 = math.exp %561 : vector<2x32xf32>
    %cst_204 = arith.constant 1.000000e+00 : f32
    %563 = vector.broadcast %cst_204 : f32 to vector<2x32xf32>
    %564 = arith.addf %563, %562 : vector<2x32xf32>
    %cst_205 = arith.constant 1.000000e+00 : f32
    %565 = vector.broadcast %cst_205 : f32 to vector<2x32xf32>
    %566 = arith.divf %565, %564 : vector<2x32xf32>
    %567 = vector.extract_strided_slice %558 {offsets = [0, 32], sizes = [2, 32], strides = [1, 1]} : vector<2x128xf32> to vector<2x32xf32>
    %cst_206 = arith.constant 0.000000e+00 : f32
    %568 = vector.broadcast %cst_206 : f32 to vector<2x32xf32>
    %569 = arith.subf %568, %567 : vector<2x32xf32>
    %570 = math.exp %569 : vector<2x32xf32>
    %cst_207 = arith.constant 1.000000e+00 : f32
    %571 = vector.broadcast %cst_207 : f32 to vector<2x32xf32>
    %572 = arith.addf %571, %570 : vector<2x32xf32>
    %cst_208 = arith.constant 1.000000e+00 : f32
    %573 = vector.broadcast %cst_208 : f32 to vector<2x32xf32>
    %574 = arith.divf %573, %572 : vector<2x32xf32>
    %575 = vector.extract_strided_slice %558 {offsets = [0, 64], sizes = [2, 32], strides = [1, 1]} : vector<2x128xf32> to vector<2x32xf32>
    %576 = math.tanh %575 : vector<2x32xf32>
    %577 = vector.extract_strided_slice %558 {offsets = [0, 96], sizes = [2, 32], strides = [1, 1]} : vector<2x128xf32> to vector<2x32xf32>
    %cst_209 = arith.constant 0.000000e+00 : f32
    %578 = vector.broadcast %cst_209 : f32 to vector<2x32xf32>
    %579 = arith.subf %578, %577 : vector<2x32xf32>
    %580 = math.exp %579 : vector<2x32xf32>
    %cst_210 = arith.constant 1.000000e+00 : f32
    %581 = vector.broadcast %cst_210 : f32 to vector<2x32xf32>
    %582 = arith.addf %581, %580 : vector<2x32xf32>
    %cst_211 = arith.constant 1.000000e+00 : f32
    %583 = vector.broadcast %cst_211 : f32 to vector<2x32xf32>
    %584 = arith.divf %583, %582 : vector<2x32xf32>
    %585 = arith.mulf %574, %552 : vector<2x32xf32>
    %586 = arith.mulf %566, %576 : vector<2x32xf32>
    %587 = arith.addf %585, %586 : vector<2x32xf32>
    %588 = math.tanh %587 : vector<2x32xf32>
    %589 = arith.mulf %584, %588 : vector<2x32xf32>
    %c14_212 = arith.constant 14 : index
    %c0_213 = arith.constant 0 : index
    %590 = vector.load %arg8[%c14_212, %c0_213] : memref<16x32xf32, #tpu.memory_space<vmem>>, vector<2x32xf32>
    tpu.vector_store %arg8[%c14_212, %c0_213], %589 {strides = array<i32>} : memref<16x32xf32, #tpu.memory_space<vmem>>, vector<2x32xf32>,
    %c1 = arith.constant 1 : index
    %c0_214 = arith.constant 0 : index
    %c0_215 = arith.constant 0 : index
    %591 = vector.load %arg9[%c1, %c0_214, %c0_215] : memref<2x2x32xf32, #tpu.memory_space<vmem>>, vector<1x2x32xf32>
    %592 = vector.shape_cast %591 : vector<1x2x32xf32> to vector<2x32xf32>
    %593 = vector.shape_cast %589 : vector<2x32xf32> to vector<1x2x32xf32>
    tpu.vector_store %arg9[%c1, %c0_214, %c0_215], %593 {strides = array<i32>} : memref<2x2x32xf32, #tpu.memory_space<vmem>>, vector<1x2x32xf32>,
    %c1_216 = arith.constant 1 : index
    %c0_217 = arith.constant 0 : index
    %c0_218 = arith.constant 0 : index
    %594 = vector.load %arg10[%c1_216, %c0_217, %c0_218] : memref<2x2x32xf32, #tpu.memory_space<vmem>>, vector<1x2x32xf32>
    %595 = vector.shape_cast %594 : vector<1x2x32xf32> to vector<2x32xf32>
    %596 = vector.shape_cast %587 : vector<2x32xf32> to vector<1x2x32xf32>
    tpu.vector_store %arg10[%c1_216, %c0_217, %c0_218], %596 {strides = array<i32>} : memref<2x2x32xf32, #tpu.memory_space<vmem>>, vector<1x2x32xf32>,
    return
  }
}

</mosaic_0001>

<bundles_post_ra>
// kernel: tpu_custom_call.1
= control target key start
LH: loop header
LB: loop body
LE: loop exit
PB: predicated region body
PF: predicated region fallthrough
CT: control target
= control target key end

     0   :  { %16 = vsyncpa [#allocation3], 0  ;;  %s3356_s0 = inlined_call_operand.vmem [shape: s32[16,1], index: 0, kind: input, shape index: {}]   ;;  %s3357_s1 = inlined_call_operand.vmem [shape: f32[64,32], index: 1, kind: input, shape index: {}]   ;;  %s3358_s2 = inlined_call_operand.vmem [shape: f32[32,128], index: 2, kind: input, shape index: {}]   ;;  %s3359_s3 = inlined_call_operand.vmem [shape: f32[32,128], index: 3, kind: input, shape index: {}]   ;;  %s3360_s4 = inlined_call_operand.hbm [shape: f32[1,128], index: 4, kind: input, shape index: {}]   ;;  %s3361_s5 = inlined_call_operand.vmem [shape: f32[32,128], index: 5, kind: input, shape index: {}]   ;;  %s3362_s6 = inlined_call_operand.vmem [shape: f32[32,128], index: 6, kind: input, shape index: {}]   ;;  %s3363_s7 = inlined_call_operand.vmem [shape: f32[1,128], index: 7, kind: input, shape index: {}]   ;;  %s3364_s8 = inlined_call_operand.hbm [shape: f32[16,32], index: 8, kind: output, shape index: {0}]   ;;  %s3365_s9 = inlined_call_operand.hbm [shape: f32[2,2,32], index: 9, kind: output, shape index: {1}]   ;;  %s3366_s10 = inlined_call_operand.hbm [shape: f32[2,2,32], index: 10, kind: output, shape index: {2}]  }
   0x1   :  { %17 = vsyncpa [#allocation4], 0 }
   0x2   :  { %18 = vsyncpa [#allocation7], 0  ;;  %s2860_s13 = smov [#allocation2]   ;;  %s2766_s17 = scalar_lea.hbm %s3360_s4, 16 }
   0x3   :  { %s33_s14 = sshll.u32 %s2860_s13, 4  ;;  %p2767_p0 = scmp.ne.s32.totalorder %s3360_s4, %s2766_s17  ;;  %s34_s14 = int_to_ptr.vmem [resolvable:$true] %s33_s14 }
   0x4   :  { %p2770_p1 = scmp.lt.u32.totalorder %s2766_s17, %s3360_s4 }
   0x6   :  { %p2772_p2 = pnand %p2770_p1, %p2767_p0 }
   0x8   :  { %2775 = shalt.err (!%p2772_p2)
}
   0x9   :  { %s2776_s22 = scalar_lea.vmem %s34_s14, 16  ;;  %s2780_s23 = scalar_lea.vmem %s34_s14, 32 }
   0xa   :  { %p2777_p3 = scmp.ne.s32.totalorder %s34_s14, %s2776_s22  ;;  %p2781_p4 = scmp.lt.s32.totalorder %s34_s14, %s34_s14 }
   0xb   :  { %p2782_p5 = scmp.lt.s32.totalorder %s2780_s23, %s2776_s22 }
   0xd   :  { %p2783_p6 = por %p2782_p5, %p2781_p4 }
   0xf   :  { %p2784_p7 = pnand %p2783_p6, %p2777_p3 }
  0x11   :  { %2787 = shalt.err (!%p2784_p7)
}
  0x12   :  { %36 = dma.hbm_to_vmem [thread:$0]  %s3360_s4, 16, %s34_s14, [#allocation3]  }
  0x13   :  { %2854 = dma.done.wait [#allocation3], 16  }
  0x14   :  { %2855 = vsyncadd [#allocation3], 4294967280  ;;  %v2861_v0 = vmov 0   ;;  %v46_v1 = vld [vmem:[%s3356_s0] sm:$0xff]  ;;  %v63_v3 = vld [vmem:[%s3357_s1 + $0x8] sm:$0xff]  ;;  %v48_v21 = vlaneseq  ;;  %vm70_vm0 = vcmask 523264  }
  0x15   :  { %2637 = vset.pattern.permute.xlu0 %v2861_v0  ;;  %v62_v2 = vld [vmem:[%s3357_s1] sm:$0xff]  ;;  %v64_v4 = vld [vmem:[%s3357_s1 + $0x10] sm:$0xff]  ;;  %v65_v5 = vld [vmem:[%s3357_s1 + $0x18] sm:$0xff]  ;;  %v2862_v24 = vmov 0.0   ;;  %v2863_v31 = vmov 0.0|0.0   ;;  %vm2864_vm3 = vmmov 0  }
  0x16   :  { %51 = vperm.xlu0 %2637, %v46_v1   ;;  %v47_v6 = vld [vmem:[%s3356_s0 + $0x8] sm:$0xff]  ;;  %v2495_v7 = vpack.c.bf16 %v63_v3, %v62_v2  ;;  %v2499_v8 = vpack.c.bf16 %v65_v5, %v64_v4  ;;  %v66_v9 = vld [vmem:[%s3357_s1 + $0x20] sm:$0xff]  ;;  %v68_v12 = vld [vmem:[%s3357_s1 + $0x30] sm:$0xff]  ;;  %v49_v22 = vand.u32 127, %v48_v21  ;;  %vm167_vm4 = vcmask 261120   ;;  %s2866_s17 = smov 32  }
  0x17   :  { %v67_v10 = vld [vmem:[%s3357_s1 + $0x28] sm:$0xff]  ;;  %v69_v13 = vld [vmem:[%s3357_s1 + $0x38] sm:$0xff]  ;;  %v152_v14 = vld [vmem:[%s3358_s2] sm:$0xff]  ;;  %vm351_vm5 = vcmask 254976   ;;  %vm460_vm6 = vcmask 257026   ;;  %vm684_vm7 = vcmask 261126  }
  0x18   :  { %2496 = vmatprep.subr.bf16.mxu0 %v2495_v7  ;;  %v2503_v11 = vpack.c.bf16 %v67_v10, %v66_v9  ;;  %v153_v15 = vld [vmem:[%s3358_s2 + $0x8] sm:$0xff]  ;;  %v154_v16 = vld [vmem:[%s3358_s2 + $0x10] sm:$0xff]  ;;  %v155_v18 = vld [vmem:[%s3358_s2 + $0x18] sm:$0xff]  ;;  %v2507_v20 = vpack.c.bf16 %v69_v13, %v68_v12  ;;  %vm572_vm8 = vcmask 259076   ;;  %s2868_s2 = smov [#allocation6]   ;;  %s2869_s13 = smov [#allocation8]  }
  0x19   :  { %2498 = vmatpush3.bf16.msra.mxu0 %v2495_v7  ;;  %v2511_v17 = vpack.c.bf16 %v153_v15, %v152_v14  ;;  %v2515_v19 = vpack.c.bf16 %v155_v18, %v154_v16  ;;  %v156_v28 = vld [vmem:[%s3359_s3] sm:$0xff]  ;;  %v157_v29 = vld [vmem:[%s3359_s3 + $0x8] sm:$0xff]  ;;  %v158_v32 = vld [vmem:[%s3359_s3 + $0x10] sm:$0xff]  ;;  %s2121_s12 = sshll.u32 %s2868_s2, 4  ;;  %s2133_s4 = sshll.u32 %s2869_s13, 4  ;;  %s2122_s12 = int_to_ptr.vmem [resolvable:$true] %s2121_s12  ;;  %s3299_s4 = int_to_ptr.vmem [resolvable:$true] %s2133_s4 }
  0x1a   :  { %54 = vperm.xlu0 %2637, %v47_v6   ;;  %2500 = vmatprep.subr.bf16.mxu0 %v2499_v8  ;;  %v2991_v30 = vpack.c.bf16 %v157_v29, %v156_v28  ;;  %v159_v33 = vld [vmem:[%s3359_s3 + $0x18] sm:$0xff]  ;;  %v2156_v37 = vld [vmem:[#allocation2] ss:$0 sm:$0xff]  ;;  %s2865_s3 = smov 64   ;;  %s2870_s14 = smov [#allocation5]  }
  0x1b   :  { %2512 = vmatprep.subr.bf16.mxu1 %v2511_v17  ;;  %v3003_v34 = vpack.c.bf16 %v159_v33, %v158_v32  ;;  %s2109_s15 = sshll.u32 %s2870_s14, 4  ;;  %s2788_s16 = scalar_lea.vmem %s2122_s12, 64  ;;  %s3303_s15 = int_to_ptr.vmem [resolvable:$true] %s2109_s15 }
  0x1c   :  { %2514 = vmatpush3.bf16.msra.mxu1 %v2511_v17  ;;  %p2789_p8 = scmp.ne.s32.totalorder %s2122_s12, %s2788_s16  ;;  %p2793_p9 = scmp.lt.s32.totalorder %s2122_s12, %s2122_s12 }
  0x1d   :  { %2502 = vmatpush3.bf16.msra.mxu0 %v2499_v8  ;;  %2516 = vmatprep.subr.bf16.mxu1 %v2515_v19  ;;  %p2794_p10 = scmp.lt.s32.totalorder %s2788_s16, %s2788_s16 }
  0x1e   :  { %2504 = vmatprep.subr.bf16.mxu0 %v2503_v11 }
  0x1f   :  { %p2795_p11 = por %p2794_p10, %p2793_p9 }
  0x20   :  { %2518 = vmatpush3.bf16.msra.mxu1 %v2515_v19 }
  0x21   :  { %2506 = vmatpush3.bf16.msra.mxu0 %v2503_v11  ;;  %2519 = vmatprep.subr.bf16.mxu1 %v2863_v31  ;;  %p2796_p12 = pnand %p2795_p11, %p2789_p8 }
  0x22   :  { %2508 = vmatprep.subr.bf16.mxu0 %v2507_v20 }
  0x25   :  { %2510 = vmatpush3.bf16.msra.mxu0 %v2507_v20 }
  0x26   :  { %2525 = vmatprep.subr.bf16.mxu0 %v2863_v31 }
  0x95   :  { %v52_v23 = vpop.permute.xlu0 %51 }
  0x96   :  { %vm56_vm1 = vcmp.eq.s32.totalorder %v49_v22, %v52_v23 }
  0x97   :  { %v2152_v25 = vsel %vm56_vm1, 1.0, %v2862_v24 }
  0x98   :  { %2294 = vmatprep.mubr.msk.f32.mxu0 %vm70_vm0, %v2152_v25 }
  0x99   :  { %v55_v26 = vpop.permute.xlu0 %54 }
  0x9a   :  { %vm57_vm2 = vcmp.eq.s32.totalorder %v49_v22, %v55_v26 }
  0x9b   :  { %v2153_v27 = vsel %vm57_vm2, 1.0, %v2862_v24 }
  0x9c   :  { %2295 = vmatmul.mubr.msk.f32.vlgmr.msra.gmra.mrb[0].mxu0 %vm70_vm0, %v2153_v27 }
  0x9d   :  { %2527 = vmatpush3.bf16.msra.mxu0 %v2991_v30  ;;  %2327 = vmatprep.mubr.msk.f32.mxu0 %vm2864_vm3, %v2862_v24 }
  0x9e   :  { %2528 = vmatprep.subr.bf16.mxu0 %v2863_v31 }
  0xa1   :  { %2530 = vmatpush3.bf16.msra.mxu0 %v3003_v34 }
  0xa2   :  { %2537 = vmatprep.subr.bf16.mxu0 %v2863_v31 }
 0x16f   :  { %v2296_v35 = vpop.f32.mrb[0].mxu0 }
 0x170   :  { %v143_v36 = vpop.f32.mrb[1].mxu0 }
 0x171   :  { %2305 = vmatprep.mubr.msk.f32.mxu1 %vm167_vm4, %v143_v36 }
 0x172   :  { %2306 = vmatmul.mubr.msk.f32.vlgmr.msra.gmra.mrb[0].mxu1 %vm167_vm4, %v2296_v35 }
 0x173   :  { %2521 = vmatpush3.bf16.msra.mxu1 %v2991_v30  ;;  %2316 = vmatprep.mubr.msk.f32.mxu1 %vm2864_vm3, %v2862_v24 }
 0x174   :  { %2522 = vmatprep.subr.bf16.mxu1 %v2863_v31 }
 0x177   :  { %2524 = vmatpush3.bf16.msra.mxu1 %v3003_v34 }
 0x178   :  { %2531 = vmatprep.subr.bf16.mxu1 %v2863_v31 }
 0x17a   :  { %2317 = vmatmul.mubr.f32.vlgmr.msra.gmra.mrb[2].mxu1 %v2862_v24 }
 0x17b   :  { %2533 = vmatpush3.bf16.msra.mxu1 %v2991_v30  ;;  %2338 = vmatprep.mubr.msk.f32.mxu1 %vm2864_vm3, %v2862_v24 }
 0x17c   :  { %2534 = vmatprep.subr.bf16.mxu1 %v2863_v31 }
 0x17f   :  { %2536 = vmatpush3.bf16.msra.mxu1 %v3003_v34 }
 0x180   :  { %2543 = vmatprep.subr.bf16.mxu1 %v2863_v31 }
 0x245   :  { %v2307_v38 = vpop.f32.mrb[0].mxu1 }
 0x246   :  { %v3024_v39 = vadd.f32 %v2307_v38, %v2156_v37  ;;  %v240_v40 = vpop.f32.mrb[1].mxu1 }
 0x247   :  { %v3026_v41 = vadd.f32 %v2156_v37, %v240_v40 }
 0x24d   :  { %v318_v42 = vpop.f32.mrb[2].mxu1 }
 0x24e   :  { %v322_v43 = vadd.f32 %v318_v42, %v3026_v41  ;;  %v2318_v44 = vpop.f32.mrb[3].mxu1 }
 0x250   :  { %2638 = vtanh.f32 %v322_v43  ;;  %v323_v46 = vsub.f32 0.0, %v322_v43 }
 0x252   :  { %v324_v47 = vmul.f32 1.442695, %v323_v46 }
 0x254   :  { %2640 = vpow2.f32 %v324_v47 }
 0x25a   :  { %v2639_v45 = vpop.eup %2638 }
 0x25b   :  { %332 = vrot.lane.b32.xlu1 %v2639_v45, %s2865_s3 }
 0x25e   :  { %v2641_v48 = vpop.eup %2640 }
 0x25f   :  { %v326_v49 = vadd.f32 1.0, %v2641_v48 }
 0x261   :  { %2642 = vrcp.f32 %v326_v49 }
 0x26b   :  { %v2643_v50 = vpop.eup %2642 }
 0x26c   :  { %v330_v53 = vmul.f32 0.0, %v2643_v50 }
 0x2cd   :  { %v333_v51 = vpop.permute.xlu1 %332 }
 0x2ce   :  { %v335_v52 = vmul.f32 %v2643_v50, %v333_v51 }
 0x2d0   :  { %337 = vrot.lane.b32.xlu1 %v335_v52, %s2866_s17 }
 0x342   :  { %v338_v54 = vpop.permute.xlu1 %337 }
 0x343   :  { %v340_v55 = vadd.f32 %v338_v54, %v330_v53 }
 0x345   :  { %2644 = vtanh.f32 %v340_v55  ;;  %v437_v8 = vrot.slane %v340_v55, 6 }
 0x34f   :  { %v2645_v56 = vpop.eup %2644 }
 0x350   :  { %343 = vrot.lane.b32.xlu0 %v2645_v56, %s2865_s3 }
 0x3c2   :  { %v344_v57 = vpop.permute.xlu0 %343 }
 0x3c3   :  { %v346_v58 = vmul.f32 %v2643_v50, %v344_v57 }
 0x3c5   :  { %348 = vrot.lane.b32.xlu1 %v346_v58, %s2866_s17 }
 0x437   :  { %v349_v59 = vpop.permute.xlu1 %348 }
 0x438   :  { %352 = vst.msk [vmem:[#allocation5] sm:$0x3] %vm351_vm5, %v349_v59  ;;  %2328 = vmatmul.mubr.msk.f32.vlgmr.msra.gmra.mrb[2].mxu0 %vm167_vm4, %v349_v59 }
 0x439   :  { %2539 = vmatpush3.bf16.msra.mxu0 %v2991_v30  ;;  %2349 = vmatprep.mubr.msk.f32.mxu0 %vm2864_vm3, %v2862_v24 }
 0x43a   :  { %2540 = vmatprep.subr.bf16.mxu0 %v2863_v31 }
 0x43d   :  { %2542 = vmatpush3.bf16.msra.mxu0 %v3003_v34 }
 0x43e   :  { %2549 = vmatprep.subr.bf16.mxu0 %v2863_v31 }
 0x50b   :  { %v421_v60 = vpop.f32.mrb[2].mxu0 }
 0x50c   :  { %v426_v61 = vrot.slane %v421_v60, 6  ;;  %v2329_v62 = vpop.f32.mrb[3].mxu0 }
 0x50e   :  { %v428_v63 = vadd.f32 %v426_v61, %v3026_v41 }
 0x510   :  { %2646 = vtanh.f32 %v428_v63  ;;  %v429_v1 = vsub.f32 0.0, %v428_v63 }
 0x512   :  { %v430_v2 = vmul.f32 1.442695, %v429_v1 }
 0x514   :  { %2648 = vpow2.f32 %v430_v2 }
 0x51a   :  { %v2647_v0 = vpop.eup %2646 }
 0x51b   :  { %441 = vrot.lane.b32.xlu0 %v2647_v0, %s2865_s3 }
 0x51e   :  { %v2649_v3 = vpop.eup %2648 }
 0x51f   :  { %v432_v4 = vadd.f32 1.0, %v2649_v3 }
 0x521   :  { %2650 = vrcp.f32 %v432_v4 }
 0x52b   :  { %v2651_v5 = vpop.eup %2650 }
 0x52c   :  { %v439_v9 = vmul.f32 %v2651_v5, %v437_v8 }
 0x58d   :  { %v442_v6 = vpop.permute.xlu0 %441 }
 0x58e   :  { %v444_v7 = vmul.f32 %v2651_v5, %v442_v6 }
 0x590   :  { %446 = vrot.lane.b32.xlu1 %v444_v7, %s2866_s17 }
 0x602   :  { %v447_v10 = vpop.permute.xlu1 %446 }
 0x603   :  { %v449_v11 = vadd.f32 %v447_v10, %v439_v9 }
 0x605   :  { %2652 = vtanh.f32 %v449_v11  ;;  %v549_v32 = vrot.slane %v449_v11, 6 }
 0x60f   :  { %v2653_v12 = vpop.eup %2652 }
 0x610   :  { %452 = vrot.lane.b32.xlu0 %v2653_v12, %s2865_s3 }
 0x682   :  { %v453_v13 = vpop.permute.xlu0 %452 }
 0x683   :  { %v3045_v14 = vmul.f32 %v2651_v5, %v453_v13 }
 0x685   :  { %v462_v15 = vrot.slane %v3045_v14, 2 }
 0x687   :  { %463 = vrot.lane.b32.xlu1 %v462_v15, %s2866_s17 }
 0x6f9   :  { %v464_v16 = vpop.permute.xlu1 %463 }
 0x6fa   :  { %2339 = vmatmul.mubr.msk.f32.vlgmr.msra.gmra.mrb[4].mxu1 %vm167_vm4, %v464_v16 }
 0x6fb   :  { %2545 = vmatpush3.bf16.msra.mxu1 %v2991_v30  ;;  %2360 = vmatprep.mubr.msk.f32.mxu1 %vm2864_vm3, %v2862_v24 }
 0x6fc   :  { %2546 = vmatprep.subr.bf16.mxu1 %v2863_v31 }
 0x6ff   :  { %2548 = vmatpush3.bf16.msra.mxu1 %v3003_v34 }
 0x700   :  { %2555 = vmatprep.subr.bf16.mxu1 %v2863_v31 }
 0x7cd   :  { %v533_v17 = vpop.f32.mrb[4].mxu1 }
 0x7ce   :  { %v538_v18 = vrot.slane %v533_v17, 4  ;;  %v2340_v19 = vpop.f32.mrb[5].mxu1 }
 0x7d0   :  { %v540_v20 = vadd.f32 %v538_v18, %v3026_v41 }
 0x7d2   :  { %2654 = vtanh.f32 %v540_v20  ;;  %v541_v22 = vsub.f32 0.0, %v540_v20 }
 0x7d4   :  { %v542_v23 = vmul.f32 1.442695, %v541_v22 }
 0x7d6   :  { %2656 = vpow2.f32 %v542_v23 }
 0x7dc   :  { %v2655_v21 = vpop.eup %2654 }
 0x7dd   :  { %553 = vrot.lane.b32.xlu0 %v2655_v21, %s2865_s3 }
 0x7e0   :  { %v2657_v25 = vpop.eup %2656 }
 0x7e1   :  { %v544_v26 = vadd.f32 1.0, %v2657_v25 }
 0x7e3   :  { %2658 = vrcp.f32 %v544_v26 }
 0x7ed   :  { %v2659_v27 = vpop.eup %2658 }
 0x7ee   :  { %v551_v33 = vmul.f32 %v2659_v27, %v549_v32 }
 0x84f   :  { %v554_v28 = vpop.permute.xlu0 %553 }
 0x850   :  { %v556_v29 = vmul.f32 %v2659_v27, %v554_v28 }
 0x852   :  { %558 = vrot.lane.b32.xlu1 %v556_v29, %s2866_s17 }
 0x8c4   :  { %v559_v35 = vpop.permute.xlu1 %558 }
 0x8c5   :  { %v561_v36 = vadd.f32 %v559_v35, %v551_v33 }
 0x8c7   :  { %2660 = vtanh.f32 %v561_v36  ;;  %v661_v56 = vrot.slane %v561_v36, 6 }
 0x8d1   :  { %v2661_v37 = vpop.eup %2660 }
 0x8d2   :  { %564 = vrot.lane.b32.xlu0 %v2661_v37, %s2865_s3 }
 0x944   :  { %v565_v38 = vpop.permute.xlu0 %564 }
 0x945   :  { %v3060_v40 = vmul.f32 %v2659_v27, %v565_v38 }
 0x947   :  { %v574_v42 = vrot.slane %v3060_v40, 4 }
 0x949   :  { %575 = vrot.lane.b32.xlu1 %v574_v42, %s2866_s17 }
 0x9bb   :  { %v576_v43 = vpop.permute.xlu1 %575 }
 0x9bc   :  { %2350 = vmatmul.mubr.msk.f32.vlgmr.msra.gmra.mrb[4].mxu0 %vm167_vm4, %v576_v43 }
 0x9bd   :  { %2551 = vmatpush3.bf16.msra.mxu0 %v2991_v30  ;;  %2371 = vmatprep.mubr.msk.f32.mxu0 %vm2864_vm3, %v2862_v24 }
 0x9be   :  { %2552 = vmatprep.subr.bf16.mxu0 %v2863_v31 }
 0x9c1   :  { %2554 = vmatpush3.bf16.msra.mxu0 %v3003_v34 }
 0x9c2   :  { %2561 = vmatprep.subr.bf16.mxu0 %v2863_v31 }
 0xa8f   :  { %v645_v44 = vpop.f32.mrb[4].mxu0 }
 0xa90   :  { %v650_v45 = vrot.slane %v645_v44, 2  ;;  %v2351_v46 = vpop.f32.mrb[5].mxu0 }
 0xa92   :  { %v652_v47 = vadd.f32 %v650_v45, %v3026_v41 }
 0xa94   :  { %2662 = vtanh.f32 %v652_v47  ;;  %v653_v49 = vsub.f32 0.0, %v652_v47 }
 0xa96   :  { %v654_v50 = vmul.f32 1.442695, %v653_v49 }
 0xa98   :  { %2664 = vpow2.f32 %v654_v50 }
 0xa9e   :  { %v2663_v48 = vpop.eup %2662 }
 0xa9f   :  { %665 = vrot.lane.b32.xlu0 %v2663_v48, %s2865_s3 }
 0xaa2   :  { %v2665_v51 = vpop.eup %2664 }
 0xaa3   :  { %v656_v52 = vadd.f32 1.0, %v2665_v51 }
 0xaa5   :  { %2666 = vrcp.f32 %v656_v52 }
 0xaaf   :  { %v2667_v53 = vpop.eup %2666 }
 0xab0   :  { %v663_v57 = vmul.f32 %v2667_v53, %v661_v56 }
 0xb11   :  { %v666_v54 = vpop.permute.xlu0 %665 }
 0xb12   :  { %v668_v55 = vmul.f32 %v2667_v53, %v666_v54 }
 0xb14   :  { %670 = vrot.lane.b32.xlu1 %v668_v55, %s2866_s17 }
 0xb86   :  { %v671_v58 = vpop.permute.xlu1 %670 }
 0xb87   :  { %v673_v59 = vadd.f32 %v671_v58, %v663_v57 }
 0xb89   :  { %2668 = vtanh.f32 %v673_v59  ;;  %v770_v11 = vrot.slane %v673_v59, 6 }
 0xb93   :  { %v2669_v41 = vpop.eup %2668 }
 0xb94   :  { %676 = vrot.lane.b32.xlu0 %v2669_v41, %s2865_s3 }
 0xc06   :  { %v677_v60 = vpop.permute.xlu0 %676 }
 0xc07   :  { %v3075_v61 = vmul.f32 %v2667_v53, %v677_v60 }
 0xc09   :  { %v686_v62 = vrot.slane %v3075_v61, 6 }
 0xc0b   :  { %687 = vrot.lane.b32.xlu1 %v686_v62, %s2866_s17 }
 0xc7d   :  { %v688_v63 = vpop.permute.xlu1 %687 }
 0xc7e   :  { %2361 = vmatmul.mubr.msk.f32.vlgmr.msra.gmra.mrb[6].mxu1 %vm167_vm4, %v688_v63 }
 0xc7f   :  { %2557 = vmatpush3.bf16.msra.mxu1 %v2991_v30  ;;  %2382 = vmatprep.mubr.msk.f32.mxu1 %vm2864_vm3, %v2862_v24 }
 0xc80   :  { %2558 = vmatprep.subr.bf16.mxu1 %v2863_v31 }
 0xc83   :  { %2560 = vmatpush3.bf16.msra.mxu1 %v3003_v34 }
 0xd51   :  { %v757_v0 = vpop.f32.mrb[6].mxu1 }
 0xd52   :  { %v761_v1 = vadd.f32 %v757_v0, %v3024_v39  ;;  %v2362_v2 = vpop.f32.mrb[7].mxu1 }
 0xd54   :  { %2670 = vtanh.f32 %v761_v1  ;;  %v762_v4 = vsub.f32 0.0, %v761_v1 }
 0xd56   :  { %v763_v5 = vmul.f32 1.442695, %v762_v4 }
 0xd58   :  { %2672 = vpow2.f32 %v763_v5 }
 0xd5e   :  { %v2671_v3 = vpop.eup %2670 }
 0xd5f   :  { %774 = vrot.lane.b32.xlu0 %v2671_v3, %s2865_s3 }
 0xd62   :  { %v2673_v6 = vpop.eup %2672 }
 0xd63   :  { %v765_v7 = vadd.f32 1.0, %v2673_v6 }
 0xd65   :  { %2674 = vrcp.f32 %v765_v7 }
 0xd6f   :  { %v2675_v8 = vpop.eup %2674 }
 0xd70   :  { %v772_v12 = vmul.f32 %v2675_v8, %v770_v11 }
 0xdd1   :  { %v775_v9 = vpop.permute.xlu0 %774 }
 0xdd2   :  { %v777_v10 = vmul.f32 %v2675_v8, %v775_v9 }
 0xdd4   :  { %779 = vrot.lane.b32.xlu1 %v777_v10, %s2866_s17 }
 0xe46   :  { %v780_v13 = vpop.permute.xlu1 %779 }
 0xe47   :  { %v782_v15 = vadd.f32 %v780_v13, %v772_v12 }
 0xe49   :  { %2676 = vtanh.f32 %v782_v15  ;;  %v878_v33 = vrot.slane %v782_v15, 6 }
 0xe53   :  { %v2677_v16 = vpop.eup %2676 }
 0xe54   :  { %785 = vrot.lane.b32.xlu0 %v2677_v16, %s2865_s3 }
 0xec6   :  { %v786_v17 = vpop.permute.xlu0 %785 }
 0xec7   :  { %v788_v18 = vmul.f32 %v2675_v8, %v786_v17 }
 0xec9   :  { %790 = vrot.lane.b32.xlu1 %v788_v18, %s2866_s17 }
 0xf3b   :  { %v791_v19 = vpop.permute.xlu1 %790 }
 0xf3c   :  { %793 = vst.msk [vmem:[#allocation5 + $0x8] sm:$0x3] %vm351_vm5, %v791_v19  ;;  %2372 = vmatmul.mubr.msk.f32.vlgmr.msra.gmra.mrb[6].mxu0 %vm167_vm4, %v791_v19 }
 0xf3d   :  { %2563 = vmatpush3.bf16.msra.mxu0 %v2991_v30  ;;  %2393 = vmatprep.mubr.msk.f32.mxu0 %vm2864_vm3, %v2862_v24 }
 0xf3e   :  { %2564 = vmatprep.subr.bf16.mxu0 %v2863_v31 }
 0xf41   :  { %2566 = vmatpush3.bf16.msra.mxu0 %v3003_v34 }
 0xf42   :  { %2575 = vmatprep.subr.bf16.mxu0 %v2863_v31 }
0x100f   :  { %v862_v20 = vpop.f32.mrb[6].mxu0 }
0x1010   :  { %v867_v21 = vrot.slane %v862_v20, 6  ;;  %v2373_v22 = vpop.f32.mrb[7].mxu0 }
0x1011   :  { %v1133_v22 = vld [vmem:[%s3361_s5 + $0x8] sm:$0xff] }
0x1012   :  { %v869_v23 = vadd.f32 %v867_v21, %v3024_v39  ;;  %v1132_v21 = vld [vmem:[%s3361_s5] sm:$0xff] }
0x1014   :  { %2678 = vtanh.f32 %v869_v23  ;;  %v870_v26 = vsub.f32 0.0, %v869_v23  ;;  %v2567_v23 = vpack.c.bf16 %v1133_v22, %v1132_v21 }
0x1016   :  { %v871_v30 = vmul.f32 1.442695, %v870_v26  ;;  %2568 = vmatprep.subr.bf16.mxu1 %v2567_v23  ;;  %v1134_v26 = vld [vmem:[%s3361_s5 + $0x10] sm:$0xff] }
0x1018   :  { %2680 = vpow2.f32 %v871_v30 }
0x101e   :  { %v2679_v25 = vpop.eup %2678 }
0x101f   :  { %882 = vrot.lane.b32.xlu0 %v2679_v25, %s2865_s3  ;;  %v1136_v25 = vld [vmem:[%s3362_s6] sm:$0xff] }
0x1022   :  { %v2681_v27 = vpop.eup %2680 }
0x1023   :  { %v873_v28 = vadd.f32 1.0, %v2681_v27  ;;  %v1135_v27 = vld [vmem:[%s3361_s5 + $0x18] sm:$0xff] }
0x1025   :  { %2682 = vrcp.f32 %v873_v28  ;;  %v1138_v28 = vld [vmem:[%s3362_s6 + $0x10] sm:$0xff] }
0x102f   :  { %v2683_v29 = vpop.eup %2682 }
0x1030   :  { %v880_v35 = vmul.f32 %v2683_v29, %v878_v33 }
0x1091   :  { %v883_v32 = vpop.permute.xlu0 %882 }
0x1092   :  { %v885_v34 = vmul.f32 %v2683_v29, %v883_v32  ;;  %v2571_v32 = vpack.c.bf16 %v1135_v27, %v1134_v26 }
0x1094   :  { %887 = vrot.lane.b32.xlu1 %v885_v34, %s2866_s17 }
0x1106   :  { %v888_v36 = vpop.permute.xlu1 %887 }
0x1107   :  { %v890_v37 = vadd.f32 %v888_v36, %v880_v35 }
0x1109   :  { %2684 = vtanh.f32 %v890_v37  ;;  %v989_v58 = vrot.slane %v890_v37, 6 }
0x1113   :  { %v2685_v38 = vpop.eup %2684 }
0x1114   :  { %893 = vrot.lane.b32.xlu0 %v2685_v38, %s2865_s3 }
0x1186   :  { %v894_v42 = vpop.permute.xlu0 %893 }
0x1187   :  { %v3102_v43 = vmul.f32 %v2683_v29, %v894_v42  ;;  %v1139_v29 = vld [vmem:[%s3362_s6 + $0x18] sm:$0xff] }
0x1188   :  { %v3161_v34 = vpack.c.bf16 %v1139_v29, %v1138_v28 }
0x1189   :  { %v902_v44 = vrot.slane %v3102_v43, 2 }
0x118b   :  { %903 = vrot.lane.b32.xlu1 %v902_v44, %s2866_s17 }
0x11fd   :  { %v904_v45 = vpop.permute.xlu1 %903 }
0x11fe   :  { %2383 = vmatmul.mubr.msk.f32.vlgmr.msra.gmra.mrb[8].mxu1 %vm167_vm4, %v904_v45 }
0x11ff   :  { %2570 = vmatpush3.bf16.msra.mxu1 %v2567_v23 }
0x1200   :  { %2572 = vmatprep.subr.bf16.mxu1 %v2571_v32 }
0x1203   :  { %2574 = vmatpush3.bf16.msra.mxu1 %v2571_v32 }
0x1204   :  { %2581 = vmatprep.subr.bf16.mxu1 %v2863_v31 }
0x12d1   :  { %v973_v46 = vpop.f32.mrb[8].mxu1 }
0x12d2   :  { %v978_v47 = vrot.slane %v973_v46, 4  ;;  %v2384_v48 = vpop.f32.mrb[9].mxu1  ;;  %v2166_v46 = vld [vmem:[%s3363_s7] ss:$0 sm:$0xff]  ;;  %s2867_s7 = smov 96  }
0x12d4   :  { %v980_v49 = vadd.f32 %v978_v47, %v3024_v39 }
0x12d6   :  { %2686 = vtanh.f32 %v980_v49  ;;  %v981_v51 = vsub.f32 0.0, %v980_v49 }
0x12d8   :  { %v982_v52 = vmul.f32 1.442695, %v981_v51 }
0x12da   :  { %2688 = vpow2.f32 %v982_v52 }
0x12e0   :  { %v2687_v50 = vpop.eup %2686 }
0x12e1   :  { %993 = vrot.lane.b32.xlu0 %v2687_v50, %s2865_s3 }
0x12e4   :  { %v2689_v53 = vpop.eup %2688 }
0x12e5   :  { %v984_v54 = vadd.f32 1.0, %v2689_v53 }
0x12e7   :  { %2690 = vrcp.f32 %v984_v54 }
0x12f1   :  { %v2691_v55 = vpop.eup %2690 }
0x12f2   :  { %v991_v59 = vmul.f32 %v2691_v55, %v989_v58 }
0x1353   :  { %v994_v56 = vpop.permute.xlu0 %993 }
0x1354   :  { %v996_v57 = vmul.f32 %v2691_v55, %v994_v56 }
0x1356   :  { %998 = vrot.lane.b32.xlu1 %v996_v57, %s2866_s17 }
0x13c8   :  { %v999_v41 = vpop.permute.xlu1 %998 }
0x13c9   :  { %v1001_v60 = vadd.f32 %v999_v41, %v991_v59 }
0x13cb   :  { %2692 = vtanh.f32 %v1001_v60 }
0x13d5   :  { %v2693_v62 = vpop.eup %2692 }
0x13d6   :  { %1004 = vrot.lane.b32.xlu0 %v2693_v62, %s2865_s3 }
0x1448   :  { %v1005_v63 = vpop.permute.xlu0 %1004 }
0x1449   :  { %v1007_v0 = vmul.f32 %v2691_v55, %v1005_v63 }
0x144b   :  { %v1013_v1 = vrot.slane %v1007_v0, 4 }
0x144d   :  { %1014 = vrot.lane.b32.xlu1 %v1013_v1, %s2866_s17 }
0x14bf   :  { %v1015_v2 = vpop.permute.xlu1 %1014 }
0x14c0   :  { %2394 = vmatmul.mubr.msk.f32.vlgmr.msra.gmra.mrb[8].mxu0 %vm167_vm4, %v1015_v2 }
0x14c1   :  { %2415 = vmatprep.mubr.msk.f32.mxu0 %vm2864_vm3, %v2862_v24 }
0x1593   :  { %v1084_v3 = vpop.f32.mrb[8].mxu0 }
0x1594   :  { %v1089_v4 = vrot.slane %v1084_v3, 2  ;;  %v2395_v5 = vpop.f32.mrb[9].mxu0 }
0x1596   :  { %v1091_v6 = vadd.f32 %v1089_v4, %v3024_v39  ;;  %v1100_v39 = vrot.slane %v1001_v60, 6 }
0x1598   :  { %2694 = vtanh.f32 %v1091_v6  ;;  %v1092_v8 = vsub.f32 0.0, %v1091_v6 }
0x159a   :  { %v1093_v9 = vmul.f32 1.442695, %v1092_v8 }
0x159c   :  { %2696 = vpow2.f32 %v1093_v9 }
0x15a2   :  { %v2695_v7 = vpop.eup %2694 }
0x15a3   :  { %1104 = vrot.lane.b32.xlu0 %v2695_v7, %s2865_s3 }
0x15a6   :  { %v2697_v10 = vpop.eup %2696 }
0x15a7   :  { %v1095_v11 = vadd.f32 1.0, %v2697_v10 }
0x15a9   :  { %2698 = vrcp.f32 %v1095_v11 }
0x15b3   :  { %v2699_v12 = vpop.eup %2698 }
0x15b4   :  { %v1102_v16 = vmul.f32 %v2699_v12, %v1100_v39 }
0x1615   :  { %v1105_v13 = vpop.permute.xlu0 %1104 }
0x1616   :  { %v1107_v15 = vmul.f32 %v2699_v12, %v1105_v13 }
0x1618   :  { %1109 = vrot.lane.b32.xlu1 %v1107_v15, %s2866_s17 }
0x161c   :  { %457 = vrot.lane.b32.xlu1 %v3045_v14, %s2866_s17 }
0x1620   :  { %681 = vrot.lane.b32.xlu1 %v3075_v61, %s2866_s17 }
0x1624   :  { %1009 = vrot.lane.b32.xlu1 %v1007_v0, %s2866_s17 }
0x168a   :  { %v1110_v17 = vpop.permute.xlu1 %1109 }
0x168b   :  { %v3123_v18 = vadd.f32 %v1110_v17, %v1102_v16 }
0x168d   :  { %2700 = vtanh.f32 %v3123_v18 }
0x168e   :  { %v458_v19 = vpop.permute.xlu1 %457 }
0x168f   :  { %461 = vst.msk [vmem:[#allocation5] sm:$0xc] %vm460_vm6, %v458_v19 }
0x1692   :  { %v682_v20 = vpop.permute.xlu1 %681 }
0x1693   :  { %685 = vst.msk [vmem:[#allocation5] sm:$0xc0] %vm684_vm7, %v682_v20 }
0x1696   :  { %v1010_v14 = vpop.permute.xlu1 %1009 }
0x1697   :  { %v2701_v61 = vpop.eup %2700  ;;  %1012 = vst.msk [vmem:[#allocation5 + $0x8] sm:$0x30] %vm572_vm8, %v1010_v14 }
0x1698   :  { %1115 = vrot.lane.b32.xlu0 %v2701_v61, %s2865_s3 }
0x169c   :  { %569 = vrot.lane.b32.xlu0 %v3060_v40, %s2866_s17  ;;  %v1137_v40 = vld [vmem:[%s3362_s6 + $0x8] sm:$0xff] }
0x169d   :  { %v3149_v30 = vpack.c.bf16 %v1137_v40, %v1136_v25 }
0x169f   :  { %2577 = vmatpush3.bf16.msra.mxu0 %v3149_v30 }
0x16a0   :  { %898 = vrot.lane.b32.xlu0 %v3102_v43, %s2866_s17  ;;  %2578 = vmatprep.subr.bf16.mxu0 %v2863_v31 }
0x16a3   :  { %2580 = vmatpush3.bf16.msra.mxu0 %v3161_v34 }
0x16a4   :  { %2587 = vmatprep.subr.bf16.mxu0 %v2863_v31 }
0x16a6   :  { %2416 = vmatmul.mubr.f32.vlgmr.msra.gmra.mrb[10].mxu0 %v2862_v24 }
0x16a7   :  { %2589 = vmatpush3.bf16.msra.mxu0 %v3149_v30  ;;  %2437 = vmatprep.mubr.msk.f32.mxu0 %vm2864_vm3, %v2862_v24 }
0x16a8   :  { %2590 = vmatprep.subr.bf16.mxu0 %v2863_v31 }
0x16ab   :  { %2592 = vmatpush3.bf16.msra.mxu0 %v3161_v34 }
0x16ac   :  { %2599 = vmatprep.subr.bf16.mxu0 %v2863_v31 }
0x170a   :  { %v1116_v33 = vpop.permute.xlu0 %1115 }
0x170b   :  { %v1118_v35 = vmul.f32 %v2699_v12, %v1116_v33 }
0x170d   :  { %1120 = vrot.lane.b32.xlu0 %v1118_v35, %s2866_s17 }
0x170e   :  { %v570_v36 = vpop.permute.xlu0 %569 }
0x170f   :  { %573 = vst.msk [vmem:[#allocation5] sm:$0x30] %vm572_vm8, %v570_v36 }
0x1712   :  { %v899_v37 = vpop.permute.xlu0 %898 }
0x1713   :  { %901 = vst.msk [vmem:[#allocation5 + $0x8] sm:$0xc] %vm460_vm6, %v899_v37 }
0x1716   :  { %v1130_v38 = vld [vmem:[#allocation5] sm:$0xff] }
0x1717   :  { %2404 = vmatprep.mubr.msk.f32.mxu1 %vm167_vm4, %v1130_v38 }
0x1779   :  { %v1294_v44 = vpop.f32.mrb[10].mxu0 }
0x177a   :  { %v2417_v45 = vpop.f32.mrb[11].mxu0 }
0x177f   :  { %v1121_v42 = vpop.permute.xlu0 %1120 }
0x1780   :  { %1123 = vst.msk [vmem:[#allocation5 + $0x8] sm:$0xc0] %vm684_vm7, %v1121_v42  ;;  %1124 = vst.msk [vmem:[#allocation6 - $0x6] sm:$0xc0] %vm684_vm7, %v1121_v42 }
0x1787   :  { %v1131_v43 = vld [vmem:[#allocation5 + $0x8] sm:$0xff] }
0x1788   :  { %2405 = vmatmul.mubr.msk.f32.vlgmr.msra.gmra.mrb[10].mxu1 %vm167_vm4, %v1131_v43 }
0x1789   :  { %2583 = vmatpush3.bf16.msra.mxu1 %v3149_v30  ;;  %2426 = vmatprep.mubr.msk.f32.mxu1 %vm2864_vm3, %v2862_v24 }
0x178a   :  { %2584 = vmatprep.subr.bf16.mxu1 %v2863_v31 }
0x178d   :  { %2586 = vmatpush3.bf16.msra.mxu1 %v3161_v34 }
0x178e   :  { %2593 = vmatprep.subr.bf16.mxu1 %v2863_v31 }
0x185b   :  { %v2406_v47 = vpop.f32.mrb[10].mxu1 }
0x185c   :  { %v3190_v48 = vadd.f32 %v2406_v47, %v2166_v46  ;;  %v1219_v49 = vpop.f32.mrb[11].mxu1 }
0x185d   :  { %v3192_v50 = vadd.f32 %v2166_v46, %v1219_v49 }
0x185f   :  { %v1298_v51 = vadd.f32 %v1294_v44, %v3192_v50 }
0x1861   :  { %2702 = vtanh.f32 %v1298_v51  ;;  %v1299_v53 = vsub.f32 0.0, %v1298_v51 }
0x1863   :  { %v1300_v54 = vmul.f32 1.442695, %v1299_v53 }
0x1865   :  { %2704 = vpow2.f32 %v1300_v54 }
0x186b   :  { %v2703_v52 = vpop.eup %2702 }
0x186c   :  { %1308 = vrot.lane.b32.xlu1 %v2703_v52, %s2865_s3 }
0x186f   :  { %v2705_v55 = vpop.eup %2704 }
0x1870   :  { %v1302_v56 = vadd.f32 1.0, %v2705_v55 }
0x1872   :  { %2706 = vrcp.f32 %v1302_v56 }
0x187c   :  { %v2707_v57 = vpop.eup %2706 }
0x187d   :  { %v1306_v41 = vmul.f32 0.0, %v2707_v57 }
0x18de   :  { %v1309_v58 = vpop.permute.xlu1 %1308 }
0x18df   :  { %v1311_v59 = vmul.f32 %v2707_v57, %v1309_v58 }
0x18e1   :  { %1313 = vrot.lane.b32.xlu0 %v1311_v59, %s2866_s17 }
0x1953   :  { %v1314_v60 = vpop.permute.xlu0 %1313 }
0x1954   :  { %v1316_v62 = vadd.f32 %v1314_v60, %v1306_v41 }
0x1956   :  { %2708 = vtanh.f32 %v1316_v62  ;;  %v1412_v39 = vrot.slane %v1316_v62, 6 }
0x1960   :  { %v2709_v63 = vpop.eup %2708 }
0x1961   :  { %1319 = vrot.lane.b32.xlu1 %v2709_v63, %s2865_s3 }
0x19d3   :  { %v1320_v0 = vpop.permute.xlu1 %1319 }
0x19d4   :  { %v1322_v1 = vmul.f32 %v2707_v57, %v1320_v0 }
0x19d6   :  { %1324 = vrot.lane.b32.xlu0 %v1322_v1, %s2866_s17 }
0x1a48   :  { %v1325_v2 = vpop.permute.xlu0 %1324 }
0x1a49   :  { %1327 = vst.msk [vmem:[#allocation5] sm:$0x3] %vm351_vm5, %v1325_v2  ;;  %2427 = vmatmul.mubr.msk.f32.vlgmr.msra.gmra.mrb[12].mxu1 %vm167_vm4, %v1325_v2 }
0x1a4a   :  { %2595 = vmatpush3.bf16.msra.mxu1 %v3149_v30  ;;  %2448 = vmatprep.mubr.msk.f32.mxu1 %vm2864_vm3, %v2862_v24 }
0x1a4b   :  { %2596 = vmatprep.subr.bf16.mxu1 %v2863_v31 }
0x1a4e   :  { %2598 = vmatpush3.bf16.msra.mxu1 %v3161_v34 }
0x1a4f   :  { %2605 = vmatprep.subr.bf16.mxu1 %v2863_v31 }
0x1b1c   :  { %v1396_v3 = vpop.f32.mrb[12].mxu1 }
0x1b1d   :  { %v1401_v4 = vrot.slane %v1396_v3, 6  ;;  %v2428_v5 = vpop.f32.mrb[13].mxu1 }
0x1b1f   :  { %v1403_v6 = vadd.f32 %v1401_v4, %v3192_v50 }
0x1b21   :  { %2710 = vtanh.f32 %v1403_v6  ;;  %v1404_v8 = vsub.f32 0.0, %v1403_v6 }
0x1b23   :  { %v1405_v9 = vmul.f32 1.442695, %v1404_v8 }
0x1b25   :  { %2712 = vpow2.f32 %v1405_v9 }
0x1b2b   :  { %v2711_v7 = vpop.eup %2710 }
0x1b2c   :  { %1416 = vrot.lane.b32.xlu1 %v2711_v7, %s2865_s3 }
0x1b2f   :  { %v2713_v10 = vpop.eup %2712 }
0x1b30   :  { %v1407_v11 = vadd.f32 1.0, %v2713_v10 }
0x1b32   :  { %2714 = vrcp.f32 %v1407_v11 }
0x1b3c   :  { %v2715_v12 = vpop.eup %2714 }
0x1b3d   :  { %v1414_v16 = vmul.f32 %v2715_v12, %v1412_v39 }
0x1b9e   :  { %v1417_v13 = vpop.permute.xlu1 %1416 }
0x1b9f   :  { %v1419_v15 = vmul.f32 %v2715_v12, %v1417_v13 }
0x1ba1   :  { %1421 = vrot.lane.b32.xlu0 %v1419_v15, %s2866_s17 }
0x1c13   :  { %v1422_v17 = vpop.permute.xlu0 %1421 }
0x1c14   :  { %v1424_v19 = vadd.f32 %v1422_v17, %v1414_v16 }
0x1c16   :  { %2716 = vtanh.f32 %v1424_v19  ;;  %v1523_v38 = vrot.slane %v1424_v19, 6 }
0x1c20   :  { %v2717_v20 = vpop.eup %2716 }
0x1c21   :  { %1427 = vrot.lane.b32.xlu1 %v2717_v20, %s2865_s3 }
0x1c93   :  { %v1428_v14 = vpop.permute.xlu1 %1427 }
0x1c94   :  { %v3211_v61 = vmul.f32 %v2715_v12, %v1428_v14 }
0x1c96   :  { %v1436_v21 = vrot.slane %v3211_v61, 2 }
0x1c98   :  { %1437 = vrot.lane.b32.xlu0 %v1436_v21, %s2866_s17 }
0x1d0a   :  { %v1438_v22 = vpop.permute.xlu0 %1437 }
0x1d0b   :  { %2438 = vmatmul.mubr.msk.f32.vlgmr.msra.gmra.mrb[12].mxu0 %vm167_vm4, %v1438_v22 }
0x1d0c   :  { %2601 = vmatpush3.bf16.msra.mxu0 %v3149_v30  ;;  %2459 = vmatprep.mubr.msk.f32.mxu0 %vm2864_vm3, %v2862_v24 }
0x1d0d   :  { %2602 = vmatprep.subr.bf16.mxu0 %v2863_v31 }
0x1d10   :  { %2604 = vmatpush3.bf16.msra.mxu0 %v3161_v34 }
0x1d11   :  { %2611 = vmatprep.subr.bf16.mxu0 %v2863_v31 }
0x1dde   :  { %v1507_v23 = vpop.f32.mrb[12].mxu0 }
0x1ddf   :  { %v1512_v25 = vrot.slane %v1507_v23, 4  ;;  %v2439_v40 = vpop.f32.mrb[13].mxu0 }
0x1de1   :  { %v1514_v26 = vadd.f32 %v1512_v25, %v3192_v50 }
0x1de3   :  { %2718 = vtanh.f32 %v1514_v26  ;;  %v1515_v28 = vsub.f32 0.0, %v1514_v26 }
0x1de5   :  { %v1516_v29 = vmul.f32 1.442695, %v1515_v28 }
0x1de7   :  { %2720 = vpow2.f32 %v1516_v29 }
0x1ded   :  { %v2719_v27 = vpop.eup %2718 }
0x1dee   :  { %1527 = vrot.lane.b32.xlu1 %v2719_v27, %s2865_s3 }
0x1df1   :  { %v2721_v32 = vpop.eup %2720 }
0x1df2   :  { %v1518_v33 = vadd.f32 1.0, %v2721_v32 }
0x1df4   :  { %2722 = vrcp.f32 %v1518_v33 }
0x1dfe   :  { %v2723_v35 = vpop.eup %2722 }
0x1dff   :  { %v1525_v42 = vmul.f32 %v2723_v35, %v1523_v38 }
0x1e60   :  { %v1528_v36 = vpop.permute.xlu1 %1527 }
0x1e61   :  { %v1530_v37 = vmul.f32 %v2723_v35, %v1528_v36 }
0x1e63   :  { %1532 = vrot.lane.b32.xlu0 %v1530_v37, %s2866_s17 }
0x1ed5   :  { %v1533_v43 = vpop.permute.xlu0 %1532 }
0x1ed6   :  { %v1535_v44 = vadd.f32 %v1533_v43, %v1525_v42 }
0x1ed8   :  { %2724 = vtanh.f32 %v1535_v44  ;;  %v1634_v0 = vrot.slane %v1535_v44, 6 }
0x1ee2   :  { %v2725_v45 = vpop.eup %2724 }
0x1ee3   :  { %1538 = vrot.lane.b32.xlu1 %v2725_v45, %s2865_s3 }
0x1f55   :  { %v1539_v46 = vpop.permute.xlu1 %1538 }
0x1f56   :  { %v3226_v47 = vmul.f32 %v2723_v35, %v1539_v46 }
0x1f58   :  { %v1547_v49 = vrot.slane %v3226_v47, 4 }
0x1f5a   :  { %1548 = vrot.lane.b32.xlu0 %v1547_v49, %s2866_s17 }
0x1fcc   :  { %v1549_v51 = vpop.permute.xlu0 %1548 }
0x1fcd   :  { %2449 = vmatmul.mubr.msk.f32.vlgmr.msra.gmra.mrb[14].mxu1 %vm167_vm4, %v1549_v51 }
0x1fce   :  { %2607 = vmatpush3.bf16.msra.mxu1 %v3149_v30  ;;  %2470 = vmatprep.mubr.msk.f32.mxu1 %vm2864_vm3, %v2862_v24 }
0x1fcf   :  { %2608 = vmatprep.subr.bf16.mxu1 %v2863_v31 }
0x1fd2   :  { %2610 = vmatpush3.bf16.msra.mxu1 %v3161_v34 }
0x1fd3   :  { %2617 = vmatprep.subr.bf16.mxu1 %v2863_v31 }
0x20a0   :  { %v1618_v52 = vpop.f32.mrb[14].mxu1 }
0x20a1   :  { %v1623_v53 = vrot.slane %v1618_v52, 2  ;;  %v2450_v54 = vpop.f32.mrb[15].mxu1 }
0x20a3   :  { %v1625_v55 = vadd.f32 %v1623_v53, %v3192_v50 }
0x20a5   :  { %2726 = vtanh.f32 %v1625_v55  ;;  %v1626_v57 = vsub.f32 0.0, %v1625_v55 }
0x20a7   :  { %v1627_v58 = vmul.f32 1.442695, %v1626_v57 }
0x20a9   :  { %2728 = vpow2.f32 %v1627_v58 }
0x20af   :  { %v2727_v56 = vpop.eup %2726 }
0x20b0   :  { %1638 = vrot.lane.b32.xlu1 %v2727_v56, %s2865_s3 }
0x20b3   :  { %v2729_v59 = vpop.eup %2728 }
0x20b4   :  { %v1629_v41 = vadd.f32 1.0, %v2729_v59 }
0x20b6   :  { %2730 = vrcp.f32 %v1629_v41 }
0x20c0   :  { %v2731_v60 = vpop.eup %2730 }
0x20c1   :  { %v1636_v1 = vmul.f32 %v2731_v60, %v1634_v0 }
0x2122   :  { %v1639_v62 = vpop.permute.xlu1 %1638 }
0x2123   :  { %v1641_v63 = vmul.f32 %v2731_v60, %v1639_v62 }
0x2125   :  { %1643 = vrot.lane.b32.xlu0 %v1641_v63, %s2866_s17 }
0x2197   :  { %v1644_v2 = vpop.permute.xlu0 %1643 }
0x2198   :  { %v1646_v3 = vadd.f32 %v1644_v2, %v1636_v1 }
0x219a   :  { %2732 = vtanh.f32 %v1646_v3  ;;  %v1742_v20 = vrot.slane %v1646_v3, 6 }
0x21a4   :  { %v2733_v50 = vpop.eup %2732 }
0x21a5   :  { %1649 = vrot.lane.b32.xlu1 %v2733_v50, %s2865_s3 }
0x2217   :  { %v1650_v4 = vpop.permute.xlu1 %1649 }
0x2218   :  { %v3241_v5 = vmul.f32 %v2731_v60, %v1650_v4 }
0x221a   :  { %v1658_v6 = vrot.slane %v3241_v5, 6 }
0x221c   :  { %1659 = vrot.lane.b32.xlu0 %v1658_v6, %s2866_s17 }
0x228e   :  { %v1660_v7 = vpop.permute.xlu0 %1659 }
0x228f   :  { %2460 = vmatmul.mubr.msk.f32.vlgmr.msra.gmra.mrb[14].mxu0 %vm167_vm4, %v1660_v7 }
0x2290   :  { %2613 = vmatpush3.bf16.msra.mxu0 %v3149_v30  ;;  %2481 = vmatprep.mubr.msk.f32.mxu0 %vm2864_vm3, %v2862_v24 }
0x2291   :  { %2614 = vmatprep.subr.bf16.mxu0 %v2863_v31 }
0x2294   :  { %2616 = vmatpush3.bf16.msra.mxu0 %v3161_v34 }
0x2362   :  { %v1729_v8 = vpop.f32.mrb[14].mxu0 }
0x2363   :  { %v1733_v9 = vadd.f32 %v1729_v8, %v3190_v48  ;;  %v2461_v10 = vpop.f32.mrb[15].mxu0 }
0x2365   :  { %2734 = vtanh.f32 %v1733_v9  ;;  %v1734_v12 = vsub.f32 0.0, %v1733_v9 }
0x2367   :  { %v1735_v13 = vmul.f32 1.442695, %v1734_v12 }
0x2369   :  { %2736 = vpow2.f32 %v1735_v13 }
0x236f   :  { %v2735_v11 = vpop.eup %2734 }
0x2370   :  { %1746 = vrot.lane.b32.xlu1 %v2735_v11, %s2865_s3 }
0x2373   :  { %v2737_v15 = vpop.eup %2736 }
0x2374   :  { %v1737_v39 = vadd.f32 1.0, %v2737_v15 }
0x2376   :  { %2738 = vrcp.f32 %v1737_v39 }
0x2380   :  { %v2739_v16 = vpop.eup %2738 }
0x2381   :  { %v1744_v14 = vmul.f32 %v2739_v16, %v1742_v20 }
0x23e2   :  { %v1747_v17 = vpop.permute.xlu1 %1746 }
0x23e3   :  { %v1749_v19 = vmul.f32 %v2739_v16, %v1747_v17 }
0x23e5   :  { %1751 = vrot.lane.b32.xlu0 %v1749_v19, %s2866_s17 }
0x2457   :  { %v1752_v21 = vpop.permute.xlu0 %1751 }
0x2458   :  { %v1754_v22 = vadd.f32 %v1752_v21, %v1744_v14 }
0x245a   :  { %2740 = vtanh.f32 %v1754_v22 }
0x2464   :  { %v2741_v23 = vpop.eup %2740 }
0x2465   :  { %1757 = vrot.lane.b32.xlu1 %v2741_v23, %s2865_s3 }
0x24d7   :  { %v1758_v25 = vpop.permute.xlu1 %1757 }
0x24d8   :  { %v1760_v40 = vmul.f32 %v2739_v16, %v1758_v25 }
0x24da   :  { %1762 = vrot.lane.b32.xlu0 %v1760_v40, %s2866_s17 }
0x254c   :  { %v1763_v26 = vpop.permute.xlu0 %1762 }
0x254d   :  { %1765 = vst.msk [vmem:[#allocation5 + $0x8] sm:$0x3] %vm351_vm5, %v1763_v26  ;;  %2471 = vmatmul.mubr.msk.f32.vlgmr.msra.gmra.mrb[16].mxu1 %vm167_vm4, %v1763_v26 }
0x254e   :  { %2619 = vmatpush3.bf16.msra.mxu1 %v3149_v30  ;;  %2492 = vmatprep.mubr.msk.f32.mxu1 %vm2864_vm3, %v2862_v24 }
0x254f   :  { %2620 = vmatprep.subr.bf16.mxu1 %v2863_v31 }
0x2552   :  { %2622 = vmatpush3.bf16.msra.mxu1 %v3161_v34  ;;  %v1850_v34 = vrot.slane %v1754_v22, 6 }
0x2620   :  { %v1834_v27 = vpop.f32.mrb[16].mxu1 }
0x2621   :  { %v1839_v28 = vrot.slane %v1834_v27, 6  ;;  %v2472_v29 = vpop.f32.mrb[17].mxu1 }
0x2623   :  { %v1841_v32 = vadd.f32 %v1839_v28, %v3190_v48 }
0x2625   :  { %2742 = vtanh.f32 %v1841_v32  ;;  %v1842_v35 = vsub.f32 0.0, %v1841_v32 }
0x2627   :  { %v1843_v36 = vmul.f32 1.442695, %v1842_v35 }
0x2629   :  { %2744 = vpow2.f32 %v1843_v36 }
0x262f   :  { %v2743_v33 = vpop.eup %2742 }
0x2630   :  { %1854 = vrot.lane.b32.xlu1 %v2743_v33, %s2865_s3 }
0x2633   :  { %v2745_v30 = vpop.eup %2744 }
0x2634   :  { %v1845_v37 = vadd.f32 1.0, %v2745_v30 }
0x2636   :  { %2746 = vrcp.f32 %v1845_v37 }
0x2640   :  { %v2747_v24 = vpop.eup %2746 }
0x2641   :  { %v1852_v42 = vmul.f32 %v2747_v24, %v1850_v34 }
0x26a2   :  { %v1855_v38 = vpop.permute.xlu1 %1854 }
0x26a3   :  { %v1857_v31 = vmul.f32 %v2747_v24, %v1855_v38 }
0x26a5   :  { %1859 = vrot.lane.b32.xlu0 %v1857_v31, %s2866_s17 }
0x2717   :  { %v1860_v43 = vpop.permute.xlu0 %1859 }
0x2718   :  { %v1862_v44 = vadd.f32 %v1860_v43, %v1852_v42 }
0x271a   :  { %2748 = vtanh.f32 %v1862_v44  ;;  %v1961_v1 = vrot.slane %v1862_v44, 6 }
0x2724   :  { %v2749_v45 = vpop.eup %2748 }
0x2725   :  { %1865 = vrot.lane.b32.xlu1 %v2749_v45, %s2865_s3 }
0x2797   :  { %v1866_v46 = vpop.permute.xlu1 %1865 }
0x2798   :  { %v3267_v49 = vmul.f32 %v2747_v24, %v1866_v46 }
0x279a   :  { %v1874_v51 = vrot.slane %v3267_v49, 2 }
0x279c   :  { %1875 = vrot.lane.b32.xlu0 %v1874_v51, %s2866_s17 }
0x280e   :  { %v1876_v52 = vpop.permute.xlu0 %1875 }
0x280f   :  { %2482 = vmatmul.mubr.msk.f32.vlgmr.msra.gmra.mrb[16].mxu0 %vm167_vm4, %v1876_v52 }
0x28e2   :  { %v1945_v53 = vpop.f32.mrb[16].mxu0 }
0x28e3   :  { %v1950_v54 = vrot.slane %v1945_v53, 4  ;;  %v2483_v55 = vpop.f32.mrb[17].mxu0 }
0x28e5   :  { %v1952_v56 = vadd.f32 %v1950_v54, %v3190_v48 }
0x28e7   :  { %2750 = vtanh.f32 %v1952_v56  ;;  %v1953_v58 = vsub.f32 0.0, %v1952_v56 }
0x28e9   :  { %v1954_v59 = vmul.f32 1.442695, %v1953_v58 }
0x28eb   :  { %2752 = vpow2.f32 %v1954_v59 }
0x28f1   :  { %v2751_v57 = vpop.eup %2750 }
0x28f2   :  { %1965 = vrot.lane.b32.xlu1 %v2751_v57, %s2865_s3 }
0x28f5   :  { %v2753_v41 = vpop.eup %2752 }
0x28f6   :  { %v1956_v60 = vadd.f32 1.0, %v2753_v41 }
0x28f8   :  { %2754 = vrcp.f32 %v1956_v60 }
0x2902   :  { %v2755_v62 = vpop.eup %2754 }
0x2903   :  { %v1963_v2 = vmul.f32 %v2755_v62, %v1961_v1 }
0x2964   :  { %v1966_v63 = vpop.permute.xlu1 %1965 }
0x2965   :  { %v1968_v0 = vmul.f32 %v2755_v62, %v1966_v63 }
0x2967   :  { %1970 = vrot.lane.b32.xlu0 %v1968_v0, %s2866_s17 }
0x29d9   :  { %v1971_v3 = vpop.permute.xlu0 %1970 }
0x29da   :  { %v1973_v50 = vadd.f32 %v1971_v3, %v1963_v2 }
0x29dc   :  { %2756 = vtanh.f32 %v1973_v50 }
0x29e6   :  { %v2757_v4 = vpop.eup %2756 }
0x29e7   :  { %1976 = vrot.lane.b32.xlu1 %v2757_v4, %s2865_s3 }
0x2a59   :  { %v1977_v6 = vpop.permute.xlu1 %1976 }
0x2a5a   :  { %v1979_v7 = vmul.f32 %v2755_v62, %v1977_v6 }
0x2a5c   :  { %v1985_v8 = vrot.slane %v1979_v7, 4 }
0x2a5e   :  { %1986 = vrot.lane.b32.xlu0 %v1985_v8, %s2866_s17 }
0x2ad0   :  { %v1987_v9 = vpop.permute.xlu0 %1986 }
0x2ad1   :  { %2493 = vmatmul.mubr.msk.f32.vlgmr.msra.gmra.mrb[18].mxu1 %vm167_vm4, %v1987_v9 }
0x2ba4   :  { %v2056_v10 = vpop.f32.mrb[18].mxu1 }
0x2ba5   :  { %v2061_v11 = vrot.slane %v2056_v10, 2  ;;  %v2494_v12 = vpop.f32.mrb[19].mxu1 }
0x2ba7   :  { %v2063_v13 = vadd.f32 %v2061_v11, %v3190_v48  ;;  %v2072_v48 = vrot.slane %v1973_v50, 6 }
0x2ba9   :  { %2758 = vtanh.f32 %v2063_v13  ;;  %v2064_v39 = vsub.f32 0.0, %v2063_v13 }
0x2bab   :  { %v2065_v16 = vmul.f32 1.442695, %v2064_v39 }
0x2bad   :  { %2760 = vpow2.f32 %v2065_v16 }
0x2bb3   :  { %v2759_v15 = vpop.eup %2758 }
0x2bb4   :  { %2076 = vrot.lane.b32.xlu1 %v2759_v15, %s2865_s3 }
0x2bb7   :  { %v2761_v17 = vpop.eup %2760 }
0x2bb8   :  { %v2067_v19 = vadd.f32 1.0, %v2761_v17 }
0x2bba   :  { %2762 = vrcp.f32 %v2067_v19 }
0x2bc4   :  { %v2763_v20 = vpop.eup %2762 }
0x2bc5   :  { %v2074_v22 = vmul.f32 %v2763_v20, %v2072_v48 }
0x2c26   :  { %v2077_v14 = vpop.permute.xlu1 %2076 }
0x2c27   :  { %v2079_v21 = vmul.f32 %v2763_v20, %v2077_v14 }
0x2c29   :  { %2081 = vrot.lane.b32.xlu0 %v2079_v21, %s2866_s17 }
0x2c2d   :  { %1432 = vrot.lane.b32.xlu0 %v3211_v61, %s2866_s17 }
0x2c31   :  { %1654 = vrot.lane.b32.xlu0 %v3241_v5, %s2866_s17 }
0x2c9b   :  { %v2082_v23 = vpop.permute.xlu0 %2081 }
0x2c9c   :  { %v2084_v25 = vadd.f32 %v2082_v23, %v2074_v22 }
0x2c9e   :  { %2764 = vtanh.f32 %v2084_v25 }
0x2c9f   :  { %v1433_v40 = vpop.permute.xlu0 %1432 }
0x2ca0   :  { %1435 = vst.msk [vmem:[#allocation5] sm:$0xc] %vm460_vm6, %v1433_v40 }
0x2ca3   :  { %v1655_v26 = vpop.permute.xlu0 %1654 }
0x2ca4   :  { %1657 = vst.msk [vmem:[#allocation5] sm:$0xc0] %vm684_vm7, %v1655_v26 }
0x2ca8   :  { %v2765_v27 = vpop.eup %2764 }
0x2ca9   :  { %2087 = vrot.lane.b32.xlu1 %v2765_v27, %s2865_s3 }
0x2cad   :  { %1126 = vrot.lane.b32.xlu1 %v3123_v18, %s2867_s7 }
0x2cb1   :  { %1543 = vrot.lane.b32.xlu1 %v3226_v47, %s2866_s17 }
0x2cb5   :  { %1870 = vrot.lane.b32.xlu1 %v3267_v49, %s2866_s17 }
0x2cb9   :  { %2099 = vrot.lane.b32.xlu1 %v2084_v25, %s2867_s7 }
0x2d1b   :  { %v2088_v61 = vpop.permute.xlu1 %2087 }
0x2d1c   :  { %v2090_v5 = vmul.f32 %v2763_v20, %v2088_v61 }
0x2d1e   :  { %2092 = vrot.lane.b32.xlu0 %v2090_v5, %s2866_s17 }
0x2d1f   :  { %v1127_v28 = vpop.permute.xlu1 %1126 }
0x2d20   :  { %1129 = vst.msk [vmem:[#allocation8 - $0x6] sm:$0xc0] %vm684_vm7, %v1127_v28 }
0x2d22   :  { %1981 = vrot.lane.b32.xlu0 %v1979_v7, %s2866_s17 }
0x2d23   :  { %v1544_v29 = vpop.permute.xlu1 %1543 }
0x2d24   :  { %1546 = vst.msk [vmem:[#allocation5] sm:$0x30] %vm572_vm8, %v1544_v29 }
0x2d27   :  { %v1871_v18 = vpop.permute.xlu1 %1870 }
0x2d28   :  { %1873 = vst.msk [vmem:[#allocation5 + $0x8] sm:$0xc] %vm460_vm6, %v1871_v18 }
0x2d2b   :  { %v2100_v47 = vpop.permute.xlu1 %2099 }
0x2d2c   :  { %2103 = vst.msk [vmem:[#allocation8 - $0x4] sm:$0xc0] %vm684_vm7, %v2100_v47 }
0x2d90   :  { %v2093_v32 = vpop.permute.xlu0 %2092 }
0x2d91   :  { %2095 = vst.msk [vmem:[#allocation5 + $0x8] sm:$0xc0] %vm684_vm7, %v2093_v32  ;;  %2097 = vst.msk [vmem:[#allocation6 - $0x4] sm:$0xc0] %vm684_vm7, %v2093_v32 }
0x2d92   :  { %2799 = shalt.err (!%p2796_p12)
}
0x2d93   :  { %s2800_s19 = scalar_lea.hbm %s3365_s9, 64 }
0x2d94   :  { %p2801_p13 = scmp.ne.s32.totalorder %s3365_s9, %s2800_s19  ;;  %p2804_p0 = scmp.lt.u32.totalorder %s2800_s19, %s3365_s9 }
0x2d96   :  { %p2806_p1 = pnand %p2804_p0, %p2801_p13 }
0x2d98   :  { %2809 = shalt.err (!%p2806_p1)
}
0x2d99   :  { %s2871_s23 = smov 2   ;;  %s2810_s26 = scalar_lea.vmem %s3299_s4, 64 }
0x2d9a   :  { %2127 = dma.vmem_to_hbm [thread:$0]  %s2122_s12, 64, %s3365_s9, [#allocation7], %s2866_s17, %s2866_s17, %s2871_s23  }
0x2d9b   :  { %p2811_p2 = scmp.ne.s32.totalorder %s3299_s4, %s2810_s26  ;;  %p2815_p3 = scmp.lt.s32.totalorder %s3299_s4, %s3299_s4 }
0x2d9c   :  { %p2816_p4 = scmp.lt.s32.totalorder %s2810_s26, %s2810_s26 }
0x2d9e   :  { %p2817_p5 = por %p2816_p4, %p2815_p3 }
0x2da0   :  { %p2818_p6 = pnand %p2817_p5, %p2811_p2 }
0x2da2   :  { %2821 = shalt.err (!%p2818_p6)
}
0x2da3   :  { %s2822_s29 = scalar_lea.hbm %s3366_s10, 64 }
0x2da4   :  { %p2823_p7 = scmp.ne.s32.totalorder %s3366_s10, %s2822_s29  ;;  %p2826_p8 = scmp.lt.u32.totalorder %s2822_s29, %s3366_s10 }
0x2da6   :  { %p2828_p9 = pnand %p2826_p8, %p2823_p7 }
0x2da8   :  { %2831 = shalt.err (!%p2828_p9)
}
0x2da9   :  { %2139 = dma.vmem_to_hbm [thread:$0]  %s3299_s4, 64, %s3366_s10, [#allocation7], %s2866_s17, %s2866_s17, %s2871_s23   ;;  %v1982_v33 = vpop.permute.xlu0 %1981 }
0x2daa   :  { %1984 = vst.msk [vmem:[#allocation5 + $0x8] sm:$0x30] %vm572_vm8, %v1982_v33  ;;  %s2832_s7 = scalar_lea.vmem %s3303_s15, 256  ;;  %p2837_p11 = scmp.lt.s32.totalorder %s3303_s15, %s3303_s15 }
0x2dab   :  { %p2833_p10 = scmp.ne.s32.totalorder %s3303_s15, %s2832_s7  ;;  %p2838_p12 = scmp.lt.s32.totalorder %s2832_s7, %s2832_s7 }
0x2dad   :  { %p2839_p13 = por %p2838_p12, %p2837_p11 }
0x2daf   :  { %p2840_p0 = pnand %p2839_p13, %p2833_p10 }
0x2db1   :  { %2843 = shalt.err (!%p2840_p0)
}
0x2db2   :  { %s2844_s13 = scalar_lea.hbm %s3364_s8, 256 }
0x2db3   :  { %p2845_p1 = scmp.ne.s32.totalorder %s3364_s8, %s2844_s13  ;;  %p2848_p2 = scmp.lt.u32.totalorder %s2844_s13, %s3364_s8 }
0x2db5   :  { %p2850_p3 = pnand %p2848_p2, %p2845_p1 }
0x2db7   :  { %2853 = shalt.err (!%p2850_p3)
}
0x2db8   :  { %s2872_s4 = smov 128   ;;  %s2873_s3 = smov 8  }
0x2db9   :  { %2115 = dma.vmem_to_hbm [thread:$0]  %s3303_s15, 256, %s3364_s8, [#allocation4], %s2872_s4, %s2872_s4, %s2873_s3  }
0x2dba   :  { %2856 = dma.done.wait [#allocation4], 256  }
0x2dbb   :  { %2857 = vsyncadd [#allocation4], 4294967040 }
0x2dbc   :  { %2858 = dma.done.wait [#allocation7], 128  }
0x2dbd   :  { %2859 = vsyncadd [#allocation7], 4294967168 }
0x2dbe   :  { %2149 = vsyncpa [#allocation3], 1 }
0x2dbf   :  { %2150 = vsyncpa [#allocation4], 1 }
0x2dc0   :  { %2151 = vsyncpa [#allocation7], 1 }

</bundles_post_ra>
